<compile_context>
chip_gen: v6e
topology: v6e:2x2x1
jax: 0.10.0
libtpu: 0.0.40
codegen_flags: <defaults>
</compile_context>

<pallas_src>
import jax
import jax.numpy as jnp
from jax import lax
from jax.experimental import pallas as pl
from jax.experimental.pallas import tpu as pltpu

EPS = 1e-5


# ---------------------------------------------------------------------------
# In-kernel conv helper
# ---------------------------------------------------------------------------
def _conv3x3_and_stats(xv, w_ref, y_ref, stats_ref, pad_ref):
    """3x3 conv (stride 1, pad 1) + per-tile BN partial statistics.

    xv:        (NB, H, W, Cin)     f32 value (already loaded / computed)
    w_ref:     (9*Cin, Cout)       bf16, taps packed (kh, kw, cin) -> rows
    y_ref:     (NB, H, W, Cout)    bf16 conv-output tile
    stats_ref: (1, 2, Cout)        f32 per-tile [sum, sum_sq] of conv output
    pad_ref:   (NB, H+2, W+2, Cin) f32 scratch holding the halo'd input

    The nine taps become nine accumulating bf16 MXU matmuls into an f32
    accumulator; no im2col slab / lane-dim concatenate is materialized.
    """
    NB, H, W, Cin = xv.shape
    Cout = y_ref.shape[-1]
    M = NB * H * W

    # Zero only the 1-pixel halo ring; the interior is fully overwritten each
    # step. (Not gated on program_id == 0: under megacore sharding a core may
    # never execute step 0 and would otherwise read stale scratch.)
    pad_ref[:, 0:1, :, :] = jnp.zeros((NB, 1, W + 2, Cin), jnp.float32)
    pad_ref[:, H + 1:H + 2, :, :] = jnp.zeros((NB, 1, W + 2, Cin), jnp.float32)
    pad_ref[:, :, 0:1, :] = jnp.zeros((NB, H + 2, 1, Cin), jnp.float32)
    pad_ref[:, :, W + 1:W + 2, :] = jnp.zeros((NB, H + 2, 1, Cin), jnp.float32)
    pad_ref[:, 1:H + 1, 1:W + 1, :] = xv

    # Per-tap bf16 matmuls accumulated in f32 (reshapes collapse leading dims
    # only -> no lane-layout-changing reshape inside the kernel).
    acc = jnp.zeros((M, Cout), jnp.float32)
    t = 0
    for dy in range(3):
        for dx in range(3):
            tap = pad_ref[:, dy:dy + H, dx:dx + W, :].reshape(M, Cin)
            acc = acc + jnp.dot(tap.astype(jnp.bfloat16),
                                w_ref[t * Cin:(t + 1) * Cin, :],
                                preferred_element_type=jnp.float32)
            t += 1

    y_ref[...] = acc.reshape(NB, H, W, Cout).astype(y_ref.dtype)

    # Single-pass partial BatchNorm statistics (f32 sum, sum of squares).
    # Single-pass variance is clamped >= 0 downstream; f32 accumulation is
    # sufficient for typical activation magnitudes.
    s = jnp.sum(acc, axis=0, keepdims=True)        # (1, Cout)
    ss = jnp.sum(acc * acc, axis=0, keepdims=True)  # (1, Cout)
    stats_ref[...] = jnp.concatenate([s, ss], axis=0).reshape(1, 2, Cout)


def _conv1_kernel(x_ref, w_ref, y_ref, stats_ref, pad_ref):
    _conv3x3_and_stats(x_ref[...], w_ref, y_ref, stats_ref, pad_ref)


def _bn_relu_conv2_kernel(y1_ref, scale_ref, bias_ref, w_ref,
                          y2_ref, stats_ref, pad_ref):
    # BN1 (folded to per-channel scale/bias) + ReLU, fused into conv2's input.
    sc = scale_ref[...].reshape(1, 1, 1, -1)
    bs = bias_ref[...].reshape(1, 1, 1, -1)
    h = jnp.maximum(y1_ref[...].astype(jnp.float32) * sc + bs, 0.0)
    _conv3x3_and_stats(h, w_ref, y2_ref, stats_ref, pad_ref)


def _bn_add_relu_kernel(y2_ref, x_ref, scale_ref, bias_ref, out_ref):
    # BN2 (folded) + identity add + ReLU on a lane-dense (NB, H, W*C) view.
    out = (y2_ref[...].astype(jnp.float32) * scale_ref[...]
           + bias_ref[...] + x_ref[...])
    out_ref[...] = jnp.maximum(out, 0.0)


# ---------------------------------------------------------------------------
# Wrapper helpers
# ---------------------------------------------------------------------------
def _vmem_limit_bytes():
    cap = 64 << 20                      # safe fallback: v7x physical VMEM/TC
    try:
        cap = int(pltpu.get_tpu_info().vmem_capacity_bytes)
    except Exception:
        pass
    # Leave headroom for Mosaic internal scratch / pipelining bookkeeping.
    return min(cap * 3 // 4, 96 << 20)


def _pick_block_n(n, per_sample_bytes, budget_bytes):
    """Largest divisor of n whose tile fits the budget, while keeping >= 2
    grid steps whenever n >= 2 (v7x megacore sharding + pipeline overlap)."""
    best = 1
    for d in range(1, n + 1):
        if n % d != 0 or d * per_sample_bytes > budget_bytes:
            continue
        if n >= 2 and d > n // 2:
            continue
        best = d
    return best


def _fold_bn(stats, count, gamma, beta):
    """Reduce per-tile (sum, sum_sq) partials -> folded per-channel scale/bias.

    Matches PyTorch training-mode BN (biased batch variance). Variance is
    clamped at 0 to guard against fp cancellation in the single-pass form.
    """
    s = jnp.sum(stats[:, 0, :], axis=0)
    ss = jnp.sum(stats[:, 1, :], axis=0)
    mean = s / count
    var = jnp.maximum(ss / count - mean * mean, 0.0)
    scale = gamma * lax.rsqrt(var + EPS)
    bias = beta - mean * scale
    return scale.astype(jnp.float32), bias.astype(jnp.float32)


# ---------------------------------------------------------------------------
# Wrapper
# ---------------------------------------------------------------------------
def residual_block_pallas(x_nchw, w1_oihw, g1, b1, w2_oihw, g2, b2,
                          block_n=None, block_n3=None):
    """x_nchw: (N, C, H, W) f32; conv weights in PyTorch OIHW layout (no bias).

    Matches ResidualBlock.forward with stride=1, downsample=None, BatchNorm in
    training mode (batch statistics).
    """
    x = jnp.transpose(x_nchw, (0, 2, 3, 1)).astype(jnp.float32)   # NHWC
    N, H, W, Cin = x.shape
    Cout = w1_oihw.shape[0]
    assert Cin == Cout, "identity shortcut requires in_channels == out_channels"
    C = Cout

    limit = _vmem_limit_bytes()
    # Per-sample VMEM residency estimates (bytes per H*W*C element):
    #   conv pass: in x2 (<=f32) + y out x2 (bf16) + f32 halo (~1.3x) +
    #              f32 accumulator + per-tap temporaries        -> ~32 B/elem
    #   pass 3:    y2 bf16 x2 + x f32 x2 + out f32 x2 + temps   -> ~24 B/elem
    elems = H * W * max(Cin, C)
    if block_n is None:
        block_n = _pick_block_n(N, 32 * elems, limit // 2)
    assert N % block_n == 0, "block_n must divide N"
    if block_n3 is None:
        block_n3 = _pick_block_n(N, 24 * H * W * C, limit // 2)
    assert N % block_n3 == 0, "block_n3 must divide N"
    n_tiles = N // block_n
    n_tiles3 = N // block_n3
    count = float(N * H * W)

    # OIHW -> (kh, kw, Cin, Cout) -> (9*Cin, Cout) bf16, matching the tap order.
    w1p = jnp.transpose(w1_oihw, (2, 3, 1, 0)).reshape(9 * Cin, C).astype(jnp.bfloat16)
    w2p = jnp.transpose(w2_oihw, (2, 3, 1, 0)).reshape(9 * C, C).astype(jnp.bfloat16)

    par = pltpu.CompilerParams(dimension_semantics=("parallel",),
                               vmem_limit_bytes=limit)

    def tile4(bn, c):
        return pl.BlockSpec((bn, H, W, c), lambda i: (i, 0, 0, 0))

    def pinned(shape):
        return pl.BlockSpec(shape, lambda i, _n=len(shape): (0,) * _n)

    def stats_spec():
        return pl.BlockSpec((1, 2, C), lambda i: (i, 0, 0))

    # ---- pass 1: conv1 (bf16 MXU) + partial BN1 stats -----------------------
    y1, stats1 = pl.pallas_call(
        _conv1_kernel,
        out_shape=(jax.ShapeDtypeStruct((N, H, W, C), jnp.bfloat16),
                   jax.ShapeDtypeStruct((n_tiles, 2, C), jnp.float32)),
        grid_spec=pltpu.PrefetchScalarGridSpec(
            num_scalar_prefetch=0,
            grid=(n_tiles,),
            in_specs=[tile4(block_n, Cin), pinned((9 * Cin, C))],
            out_specs=(tile4(block_n, C), stats_spec()),
            scratch_shapes=[pltpu.VMEM((block_n, H + 2, W + 2, Cin), jnp.float32)],
        ),
        compiler_params=par,
    )(x, w1p)

    scale1, bias1 = _fold_bn(stats1, count, g1, b1)

    # ---- pass 2: BN1 + ReLU + conv2 (bf16 MXU) + partial BN2 stats ----------
    y2, stats2 = pl.pallas_call(
        _bn_relu_conv2_kernel,
        out_shape=(jax.ShapeDtypeStruct((N, H, W, C), jnp.bfloat16),
                   jax.ShapeDtypeStruct((n_tiles, 2, C), jnp.float32)),
        grid_spec=pltpu.PrefetchScalarGridSpec(
            num_scalar_prefetch=0,
            grid=(n_tiles,),
            in_specs=[tile4(block_n, C),
                      pinned((1, C)), pinned((1, C)),
                      pinned((9 * C, C))],
            out_specs=(tile4(block_n, C), stats_spec()),
            scratch_shapes=[pltpu.VMEM((block_n, H + 2, W + 2, C), jnp.float32)],
        ),
        compiler_params=par,
    )(y1, scale1.reshape(1, C), bias1.reshape(1, C), w2p)

    scale2, bias2 = _fold_bn(stats2, count, g2, b2)

    # ---- pass 3: BN2 + residual add + ReLU (lane-dense W*C layout) ----------
    x_flat = x.reshape(N, H, W * Cin)            # f32 identity (XLA reshape)
    y2_flat = y2.reshape(N, H, W * C)            # bf16 intermediate
    scale2_t = jnp.tile(scale2, W).reshape(1, W * C)
    bias2_t = jnp.tile(bias2, W).reshape(1, W * C)

    def tile3(bn):
        return pl.BlockSpec((bn, H, W * C), lambda i: (i, 0, 0))

    out_flat = pl.pallas_call(
        _bn_add_relu_kernel,
        out_shape=jax.ShapeDtypeStruct((N, H, W * C), jnp.float32),
        grid_spec=pltpu.PrefetchScalarGridSpec(
            num_scalar_prefetch=0,
            grid=(n_tiles3,),
            in_specs=[tile3(block_n3), tile3(block_n3),
                      pinned((1, W * C)), pinned((1, W * C))],
            out_specs=tile3(block_n3),
        ),
        compiler_params=par,
    )(y2_flat, x_flat, scale2_t, bias2_t)

    out_nhwc = out_flat.reshape(N, H, W, C)
    return jnp.transpose(out_nhwc, (0, 3, 1, 2))   # back to NCHW


# ---------------- pure-JAX reference (for correctness check) ----------------
def _conv3x3_nchw(x, w_oihw):
    return lax.conv_general_dilated(
        x, w_oihw, window_strides=(1, 1), padding=((1, 1), (1, 1)),
        dimension_numbers=("NCHW", "OIHW", "NCHW"))


def _bn_train(x_nchw, gamma, beta):
    mean = jnp.mean(x_nchw, axis=(0, 2, 3), keepdims=True)
    var = jnp.mean((x_nchw - mean) ** 2, axis=(0, 2, 3), keepdims=True)
    return ((x_nchw - mean) * lax.rsqrt(var + EPS)
            * gamma.reshape(1, -1, 1, 1) + beta.reshape(1, -1, 1, 1))


def residual_block_ref(x, w1, g1, b1, w2, g2, b2):
    out = jnp.maximum(_bn_train(_conv3x3_nchw(x, w1), g1, b1), 0.0)
    out = _bn_train(_conv3x3_nchw(out, w2), g2, b2)
    return jnp.maximum(out + x, 0.0)


if __name__ == "__main__":
    key = jax.random.PRNGKey(0)
    kx, k1, k2, kg1, kb1, kg2, kb2 = jax.random.split(key, 7)

    N, C, H, W = 2, 8, 16, 16   # in_channels == out_channels, stride=1, no downsample
    x = jax.random.normal(kx, (N, C, H, W), jnp.float32)

    w1 = jax.random.normal(k1, (C, C, 3, 3), jnp.float32) * 0.1   # OIHW
    w2 = jax.random.normal(k2, (C, C, 3, 3), jnp.float32) * 0.1   # OIHW
    g1 = 1.0 + 0.1 * jax.random.normal(kg1, (C,), jnp.float32)
    b1 = 0.1 * jax.random.normal(kb1, (C,), jnp.float32)
    g2 = 1.0 + 0.1 * jax.random.normal(kg2, (C,), jnp.float32)
    b2 = 0.1 * jax.random.normal(kb2, (C,), jnp.float32)

    # Auto-picked block_n keeps >= 2 grid steps (N=2 -> block_n=1), exercising
    # the tiled / partial-stats / megacore path.
    out = residual_block_pallas(x, w1, g1, b1, w2, g2, b2)
    out = jax.block_until_ready(out)

    ref = jax.block_until_ready(residual_block_ref(x, w1, g1, b1, w2, g2, b2))
    assert out.shape == (N, C, H, W)
    # bf16 MXU operands + bf16 intermediates -> bf16-level tolerance vs f32 ref.
    assert jnp.allclose(out, ref, rtol=5e-2, atol=5e-2), "mismatch vs reference"

    print("KERNEL_OK")
</pallas_src>

<mosaic_0001>
module attributes {stable_mosaic.version = 11 : i64} {
  func.func @_conv1_kernel(%arg0: i32, %arg1: memref<1x16x16x8xf32, #tpu.memory_space<vmem>>, %arg2: memref<72x8xbf16, #tpu.memory_space<vmem>>, %arg3: memref<1x16x16x8xbf16, #tpu.memory_space<vmem>>, %arg4: memref<1x2x8xf32, #tpu.memory_space<vmem>>, %arg5: memref<1x18x18x8xf32, #tpu.memory_space<vmem>>) attributes {dimension_semantics = [#tpu.dimension_semantics<parallel>], iteration_bounds = array<i64: 2>, scalar_prefetch = 0 : i64, scratch_operands = 1 : i64, tpu.core_type = #tpu.core_type<tc>, window_params = [{transform_indices = @transform_0, window_bounds = array<i64: 1, 16, 16, 8>}, {pipeline_mode = #tpu.pipeline_mode<synchronous>, transform_indices = @transform_1, window_bounds = array<i64: 72, 8>}, {transform_indices = @transform_2, window_bounds = array<i64: 1, 16, 16, 8>}, {transform_indices = @transform_3, window_bounds = array<i64: 1, 2, 8>}]} {
    %c0 = arith.constant 0 : index
    %c0_0 = arith.constant 0 : index
    %c0_1 = arith.constant 0 : index
    %c0_2 = arith.constant 0 : index
    %0 = vector.load %arg1[%c0, %c0_0, %c0_1, %c0_2] : memref<1x16x16x8xf32, #tpu.memory_space<vmem>>, vector<1x16x16x8xf32>
    %cst = arith.constant 0.000000e+00 : f32
    %1 = vector.broadcast %cst : f32 to vector<1x1x18x8xf32>
    %c0_3 = arith.constant 0 : index
    %c0_4 = arith.constant 0 : index
    %c0_5 = arith.constant 0 : index
    %c0_6 = arith.constant 0 : index
    %2 = vector.load %arg5[%c0_3, %c0_4, %c0_5, %c0_6] : memref<1x18x18x8xf32, #tpu.memory_space<vmem>>, vector<1x1x18x8xf32>
    tpu.vector_store %arg5[%c0_3, %c0_4, %c0_5, %c0_6], %1 {strides = array<i32>} : memref<1x18x18x8xf32, #tpu.memory_space<vmem>>, vector<1x1x18x8xf32>,
    %cst_7 = arith.constant 0.000000e+00 : f32
    %3 = vector.broadcast %cst_7 : f32 to vector<1x1x18x8xf32>
    %c0_8 = arith.constant 0 : index
    %c17 = arith.constant 17 : index
    %c0_9 = arith.constant 0 : index
    %c0_10 = arith.constant 0 : index
    %4 = vector.load %arg5[%c0_8, %c17, %c0_9, %c0_10] : memref<1x18x18x8xf32, #tpu.memory_space<vmem>>, vector<1x1x18x8xf32>
    tpu.vector_store %arg5[%c0_8, %c17, %c0_9, %c0_10], %3 {strides = array<i32>} : memref<1x18x18x8xf32, #tpu.memory_space<vmem>>, vector<1x1x18x8xf32>,
    %cst_11 = arith.constant 0.000000e+00 : f32
    %5 = vector.broadcast %cst_11 : f32 to vector<1x18x1x8xf32>
    %c0_12 = arith.constant 0 : index
    %c0_13 = arith.constant 0 : index
    %c0_14 = arith.constant 0 : index
    %c0_15 = arith.constant 0 : index
    %6 = vector.load %arg5[%c0_12, %c0_13, %c0_14, %c0_15] : memref<1x18x18x8xf32, #tpu.memory_space<vmem>>, vector<1x18x1x8xf32>
    tpu.vector_store %arg5[%c0_12, %c0_13, %c0_14, %c0_15], %5 {strides = array<i32>} : memref<1x18x18x8xf32, #tpu.memory_space<vmem>>, vector<1x18x1x8xf32>,
    %cst_16 = arith.constant 0.000000e+00 : f32
    %7 = vector.broadcast %cst_16 : f32 to vector<1x18x1x8xf32>
    %c0_17 = arith.constant 0 : index
    %c0_18 = arith.constant 0 : index
    %c17_19 = arith.constant 17 : index
    %c0_20 = arith.constant 0 : index
    %8 = vector.load %arg5[%c0_17, %c0_18, %c17_19, %c0_20] : memref<1x18x18x8xf32, #tpu.memory_space<vmem>>, vector<1x18x1x8xf32>
    tpu.vector_store %arg5[%c0_17, %c0_18, %c17_19, %c0_20], %7 {strides = array<i32>} : memref<1x18x18x8xf32, #tpu.memory_space<vmem>>, vector<1x18x1x8xf32>,
    %c0_21 = arith.constant 0 : index
    %c1 = arith.constant 1 : index
    %c1_22 = arith.constant 1 : index
    %c0_23 = arith.constant 0 : index
    %9 = vector.load %arg5[%c0_21, %c1, %c1_22, %c0_23] : memref<1x18x18x8xf32, #tpu.memory_space<vmem>>, vector<1x16x16x8xf32>
    tpu.vector_store %arg5[%c0_21, %c1, %c1_22, %c0_23], %0 {strides = array<i32>} : memref<1x18x18x8xf32, #tpu.memory_space<vmem>>, vector<1x16x16x8xf32>,
    %cst_24 = arith.constant 0.000000e+00 : f32
    %10 = vector.broadcast %cst_24 : f32 to vector<256x8xf32>
    %c0_25 = arith.constant 0 : index
    %c0_26 = arith.constant 0 : index
    %c0_27 = arith.constant 0 : index
    %c0_28 = arith.constant 0 : index
    %11 = vector.load %arg5[%c0_25, %c0_26, %c0_27, %c0_28] : memref<1x18x18x8xf32, #tpu.memory_space<vmem>>, vector<1x16x16x8xf32>
    %12 = vector.shape_cast %11 : vector<1x16x16x8xf32> to vector<256x8xf32>
    %13 = arith.truncf %12 : vector<256x8xf32> to vector<256x8xbf16>
    %c0_29 = arith.constant 0 : index
    %c0_30 = arith.constant 0 : index
    %14 = vector.load %arg2[%c0_29, %c0_30] : memref<72x8xbf16, #tpu.memory_space<vmem>>, vector<8x8xbf16>
    %cst_31 = arith.constant dense<0.000000e+00> : vector<256x8xf32>
    %15 = tpu.matmul %13, %14, %cst_31 {dimension_numbers = #tpu.dot_dimension_numbers<[1], [0], [0], [1], [0, 0, 1, 1], [], []>} : vector<256x8xbf16>, vector<8x8xbf16>, vector<256x8xf32> -> vector<256x8xf32>
    %16 = arith.addf %10, %15 : vector<256x8xf32>
    %c0_32 = arith.constant 0 : index
    %c0_33 = arith.constant 0 : index
    %c1_34 = arith.constant 1 : index
    %c0_35 = arith.constant 0 : index
    %17 = vector.load %arg5[%c0_32, %c0_33, %c1_34, %c0_35] : memref<1x18x18x8xf32, #tpu.memory_space<vmem>>, vector<1x16x16x8xf32>
    %18 = vector.shape_cast %17 : vector<1x16x16x8xf32> to vector<256x8xf32>
    %19 = arith.truncf %18 : vector<256x8xf32> to vector<256x8xbf16>
    %c8 = arith.constant 8 : index
    %c0_36 = arith.constant 0 : index
    %20 = vector.load %arg2[%c8, %c0_36] : memref<72x8xbf16, #tpu.memory_space<vmem>>, vector<8x8xbf16>
    %cst_37 = arith.constant dense<0.000000e+00> : vector<256x8xf32>
    %21 = tpu.matmul %19, %20, %cst_37 {dimension_numbers = #tpu.dot_dimension_numbers<[1], [0], [0], [1], [0, 0, 1, 1], [], []>} : vector<256x8xbf16>, vector<8x8xbf16>, vector<256x8xf32> -> vector<256x8xf32>
    %22 = arith.addf %16, %21 : vector<256x8xf32>
    %c0_38 = arith.constant 0 : index
    %c0_39 = arith.constant 0 : index
    %c2 = arith.constant 2 : index
    %c0_40 = arith.constant 0 : index
    %23 = vector.load %arg5[%c0_38, %c0_39, %c2, %c0_40] : memref<1x18x18x8xf32, #tpu.memory_space<vmem>>, vector<1x16x16x8xf32>
    %24 = vector.shape_cast %23 : vector<1x16x16x8xf32> to vector<256x8xf32>
    %25 = arith.truncf %24 : vector<256x8xf32> to vector<256x8xbf16>
    %c16 = arith.constant 16 : index
    %c0_41 = arith.constant 0 : index
    %26 = vector.load %arg2[%c16, %c0_41] : memref<72x8xbf16, #tpu.memory_space<vmem>>, vector<8x8xbf16>
    %cst_42 = arith.constant dense<0.000000e+00> : vector<256x8xf32>
    %27 = tpu.matmul %25, %26, %cst_42 {dimension_numbers = #tpu.dot_dimension_numbers<[1], [0], [0], [1], [0, 0, 1, 1], [], []>} : vector<256x8xbf16>, vector<8x8xbf16>, vector<256x8xf32> -> vector<256x8xf32>
    %28 = arith.addf %22, %27 : vector<256x8xf32>
    %c0_43 = arith.constant 0 : index
    %c1_44 = arith.constant 1 : index
    %c0_45 = arith.constant 0 : index
    %c0_46 = arith.constant 0 : index
    %29 = vector.load %arg5[%c0_43, %c1_44, %c0_45, %c0_46] : memref<1x18x18x8xf32, #tpu.memory_space<vmem>>, vector<1x16x16x8xf32>
    %30 = vector.shape_cast %29 : vector<1x16x16x8xf32> to vector<256x8xf32>
    %31 = arith.truncf %30 : vector<256x8xf32> to vector<256x8xbf16>
    %c24 = arith.constant 24 : index
    %c0_47 = arith.constant 0 : index
    %32 = vector.load %arg2[%c24, %c0_47] : memref<72x8xbf16, #tpu.memory_space<vmem>>, vector<8x8xbf16>
    %cst_48 = arith.constant dense<0.000000e+00> : vector<256x8xf32>
    %33 = tpu.matmul %31, %32, %cst_48 {dimension_numbers = #tpu.dot_dimension_numbers<[1], [0], [0], [1], [0, 0, 1, 1], [], []>} : vector<256x8xbf16>, vector<8x8xbf16>, vector<256x8xf32> -> vector<256x8xf32>
    %34 = arith.addf %28, %33 : vector<256x8xf32>
    %c0_49 = arith.constant 0 : index
    %c1_50 = arith.constant 1 : index
    %c1_51 = arith.constant 1 : index
    %c0_52 = arith.constant 0 : index
    %35 = vector.load %arg5[%c0_49, %c1_50, %c1_51, %c0_52] : memref<1x18x18x8xf32, #tpu.memory_space<vmem>>, vector<1x16x16x8xf32>
    %36 = vector.shape_cast %35 : vector<1x16x16x8xf32> to vector<256x8xf32>
    %37 = arith.truncf %36 : vector<256x8xf32> to vector<256x8xbf16>
    %c32 = arith.constant 32 : index
    %c0_53 = arith.constant 0 : index
    %38 = vector.load %arg2[%c32, %c0_53] : memref<72x8xbf16, #tpu.memory_space<vmem>>, vector<8x8xbf16>
    %cst_54 = arith.constant dense<0.000000e+00> : vector<256x8xf32>
    %39 = tpu.matmul %37, %38, %cst_54 {dimension_numbers = #tpu.dot_dimension_numbers<[1], [0], [0], [1], [0, 0, 1, 1], [], []>} : vector<256x8xbf16>, vector<8x8xbf16>, vector<256x8xf32> -> vector<256x8xf32>
    %40 = arith.addf %34, %39 : vector<256x8xf32>
    %c0_55 = arith.constant 0 : index
    %c1_56 = arith.constant 1 : index
    %c2_57 = arith.constant 2 : index
    %c0_58 = arith.constant 0 : index
    %41 = vector.load %arg5[%c0_55, %c1_56, %c2_57, %c0_58] : memref<1x18x18x8xf32, #tpu.memory_space<vmem>>, vector<1x16x16x8xf32>
    %42 = vector.shape_cast %41 : vector<1x16x16x8xf32> to vector<256x8xf32>
    %43 = arith.truncf %42 : vector<256x8xf32> to vector<256x8xbf16>
    %c40 = arith.constant 40 : index
    %c0_59 = arith.constant 0 : index
    %44 = vector.load %arg2[%c40, %c0_59] : memref<72x8xbf16, #tpu.memory_space<vmem>>, vector<8x8xbf16>
    %cst_60 = arith.constant dense<0.000000e+00> : vector<256x8xf32>
    %45 = tpu.matmul %43, %44, %cst_60 {dimension_numbers = #tpu.dot_dimension_numbers<[1], [0], [0], [1], [0, 0, 1, 1], [], []>} : vector<256x8xbf16>, vector<8x8xbf16>, vector<256x8xf32> -> vector<256x8xf32>
    %46 = arith.addf %40, %45 : vector<256x8xf32>
    %c0_61 = arith.constant 0 : index
    %c2_62 = arith.constant 2 : index
    %c0_63 = arith.constant 0 : index
    %c0_64 = arith.constant 0 : index
    %47 = vector.load %arg5[%c0_61, %c2_62, %c0_63, %c0_64] : memref<1x18x18x8xf32, #tpu.memory_space<vmem>>, vector<1x16x16x8xf32>
    %48 = vector.shape_cast %47 : vector<1x16x16x8xf32> to vector<256x8xf32>
    %49 = arith.truncf %48 : vector<256x8xf32> to vector<256x8xbf16>
    %c48 = arith.constant 48 : index
    %c0_65 = arith.constant 0 : index
    %50 = vector.load %arg2[%c48, %c0_65] : memref<72x8xbf16, #tpu.memory_space<vmem>>, vector<8x8xbf16>
    %cst_66 = arith.constant dense<0.000000e+00> : vector<256x8xf32>
    %51 = tpu.matmul %49, %50, %cst_66 {dimension_numbers = #tpu.dot_dimension_numbers<[1], [0], [0], [1], [0, 0, 1, 1], [], []>} : vector<256x8xbf16>, vector<8x8xbf16>, vector<256x8xf32> -> vector<256x8xf32>
    %52 = arith.addf %46, %51 : vector<256x8xf32>
    %c0_67 = arith.constant 0 : index
    %c2_68 = arith.constant 2 : index
    %c1_69 = arith.constant 1 : index
    %c0_70 = arith.constant 0 : index
    %53 = vector.load %arg5[%c0_67, %c2_68, %c1_69, %c0_70] : memref<1x18x18x8xf32, #tpu.memory_space<vmem>>, vector<1x16x16x8xf32>
    %54 = vector.shape_cast %53 : vector<1x16x16x8xf32> to vector<256x8xf32>
    %55 = arith.truncf %54 : vector<256x8xf32> to vector<256x8xbf16>
    %c56 = arith.constant 56 : index
    %c0_71 = arith.constant 0 : index
    %56 = vector.load %arg2[%c56, %c0_71] : memref<72x8xbf16, #tpu.memory_space<vmem>>, vector<8x8xbf16>
    %cst_72 = arith.constant dense<0.000000e+00> : vector<256x8xf32>
    %57 = tpu.matmul %55, %56, %cst_72 {dimension_numbers = #tpu.dot_dimension_numbers<[1], [0], [0], [1], [0, 0, 1, 1], [], []>} : vector<256x8xbf16>, vector<8x8xbf16>, vector<256x8xf32> -> vector<256x8xf32>
    %58 = arith.addf %52, %57 : vector<256x8xf32>
    %c0_73 = arith.constant 0 : index
    %c2_74 = arith.constant 2 : index
    %c2_75 = arith.constant 2 : index
    %c0_76 = arith.constant 0 : index
    %59 = vector.load %arg5[%c0_73, %c2_74, %c2_75, %c0_76] : memref<1x18x18x8xf32, #tpu.memory_space<vmem>>, vector<1x16x16x8xf32>
    %60 = vector.shape_cast %59 : vector<1x16x16x8xf32> to vector<256x8xf32>
    %61 = arith.truncf %60 : vector<256x8xf32> to vector<256x8xbf16>
    %c64 = arith.constant 64 : index
    %c0_77 = arith.constant 0 : index
    %62 = vector.load %arg2[%c64, %c0_77] : memref<72x8xbf16, #tpu.memory_space<vmem>>, vector<8x8xbf16>
    %cst_78 = arith.constant dense<0.000000e+00> : vector<256x8xf32>
    %63 = tpu.matmul %61, %62, %cst_78 {dimension_numbers = #tpu.dot_dimension_numbers<[1], [0], [0], [1], [0, 0, 1, 1], [], []>} : vector<256x8xbf16>, vector<8x8xbf16>, vector<256x8xf32> -> vector<256x8xf32>
    %64 = arith.addf %58, %63 : vector<256x8xf32>
    %65 = vector.shape_cast %64 : vector<256x8xf32> to vector<1x16x16x8xf32>
    %66 = arith.truncf %65 : vector<1x16x16x8xf32> to vector<1x16x16x8xbf16>
    %c0_79 = arith.constant 0 : index
    %c0_80 = arith.constant 0 : index
    %c0_81 = arith.constant 0 : index
    %c0_82 = arith.constant 0 : index
    %67 = vector.load %arg3[%c0_79, %c0_80, %c0_81, %c0_82] : memref<1x16x16x8xbf16, #tpu.memory_space<vmem>>, vector<1x16x16x8xbf16>
    tpu.vector_store %arg3[%c0_79, %c0_80, %c0_81, %c0_82], %66 {strides = array<i32>} : memref<1x16x16x8xbf16, #tpu.memory_space<vmem>>, vector<1x16x16x8xbf16>,
    %cst_83 = arith.constant dense<0.000000e+00> : vector<8xf32>
    %68 = vector.multi_reduction <add>, %64, %cst_83 [0] : vector<256x8xf32> to vector<8xf32>
    %69 = vector.shape_cast %68 : vector<8xf32> to vector<1x8xf32>
    %70 = arith.mulf %64, %64 : vector<256x8xf32>
    %cst_84 = arith.constant dense<0.000000e+00> : vector<8xf32>
    %71 = vector.multi_reduction <add>, %70, %cst_84 [0] : vector<256x8xf32> to vector<8xf32>
    %72 = vector.shape_cast %71 : vector<8xf32> to vector<1x8xf32>
    %73 = tpu.concatenate %69, %72 in 0 : vector<1x8xf32>, vector<1x8xf32> -> vector<2x8xf32>
    %74 = vector.shape_cast %73 : vector<2x8xf32> to vector<1x2x8xf32>
    %c0_85 = arith.constant 0 : index
    %c0_86 = arith.constant 0 : index
    %c0_87 = arith.constant 0 : index
    %75 = vector.load %arg4[%c0_85, %c0_86, %c0_87] : memref<1x2x8xf32, #tpu.memory_space<vmem>>, vector<1x2x8xf32>
    tpu.vector_store %arg4[%c0_85, %c0_86, %c0_87], %74 {strides = array<i32>} : memref<1x2x8xf32, #tpu.memory_space<vmem>>, vector<1x2x8xf32>,
    return
  }
  func.func @transform_0(%arg0: i32) -> (i32, i32, i32, i32) {
    %c0_i32 = arith.constant 0 : i32
    %c0_i32_0 = arith.constant 0 : i32
    %c0_i32_1 = arith.constant 0 : i32
    %c0_i32_2 = arith.constant 0 : i32
    return %arg0, %c0_i32, %c0_i32_0, %c0_i32_1 : i32, i32, i32, i32
  }
  func.func @transform_1(%arg0: i32) -> (i32, i32) {
    %c0_i32 = arith.constant 0 : i32
    %c0_i32_0 = arith.constant 0 : i32
    %c0_i32_1 = arith.constant 0 : i32
    return %c0_i32, %c0_i32_0 : i32, i32
  }
  func.func @transform_2(%arg0: i32) -> (i32, i32, i32, i32) {
    %c0_i32 = arith.constant 0 : i32
    %c0_i32_0 = arith.constant 0 : i32
    %c0_i32_1 = arith.constant 0 : i32
    %c0_i32_2 = arith.constant 0 : i32
    return %arg0, %c0_i32, %c0_i32_0, %c0_i32_1 : i32, i32, i32, i32
  }
  func.func @transform_3(%arg0: i32) -> (i32, i32, i32) {
    %c0_i32 = arith.constant 0 : i32
    %c0_i32_0 = arith.constant 0 : i32
    %c0_i32_1 = arith.constant 0 : i32
    return %arg0, %c0_i32, %c0_i32_0 : i32, i32, i32
  }
}

</mosaic_0001>

<bundles_post_ra>
// kernel: tpu_custom_call.1
= control target key start
LH: loop header
LB: loop body
LE: loop exit
PB: predicated region body
PF: predicated region fallthrough
CT: control target
= control target key end

     0   :  { %9 = vsyncpa [#allocation4], 0  ;;  %s5404_s0 = inlined_call_operand.vmem [shape: f32[2,16,16,8], index: 0, kind: input, shape index: {}]   ;;  %s5405_s1 = inlined_call_operand.vmem [shape: bf16[72,8], index: 1, kind: input, shape index: {}]   ;;  %s5406_s2 = inlined_call_operand.vmem [shape: bf16[2,16,16,8], index: 2, kind: output, shape index: {0}]   ;;  %s5407_s3 = inlined_call_operand.hbm [shape: f32[2,2,8], index: 3, kind: output, shape index: {1}]  }
   0x1   :  { %11 = vsyncpa [#allocation4 + $0x1], 0  ;;  %s4127_s12 = smov 0   ;;  %s4129_s13 = smov 0  }
   0x2   :  { %s4131_s14 = smov 0   ;;  %s4133_s15 = smov 0  }
   0x3 LB: > { %s4148_s16 = sadd.s32 4294967295, %s4103_s15   ;;  %s3309_s17 = sadd.s32 4294967294, %s4103_s15   ;;  %s4103_s15 = sphi %s4133_s15, %s5481_s15   ;;  %s4099_s14 = sphi %s4131_s14, %s5480_s14   ;;  %s4095_s13 = sphi %s4129_s13, %s5479_s13   ;;  %s4091_s12 = sphi %s4127_s12, %s5478_s12  }
   0x4   : > { %s4152_s18 = sadd.s32 1, %s4103_s15   ;;  %s97_s19 = sadd.s32 1, %s4099_s14 }
   0x5   : > { %s94_s20 = ssub.s32 %s4103_s15, %s4152_s18  ;;  %p107_p0 = scmp.ne.s32.totalorder %s4099_s14, %s4095_s13 }
   0x6   : > { %p95_p1 = scmp.eq.s32.totalorder %s94_s20, 0  ;;  %p108_p2 = scmp.eq.s32.totalorder %s4148_s16, 1 }
   0x7   : > { %p113_p3 = scmp.ne.s32.totalorder %s4095_s13, %s4091_s12  ;;  %p114_p4 = scmp.eq.s32.totalorder %s3309_s17, 1 }
   0x8   : > { %s4163_s21 = scalar_select %p95_p1, %s4099_s14, %s97_s19  }
   0x9   : > { %p4165_p5 = por %p108_p2, %p107_p0  ;;  %p4169_p6 = por %p114_p4, %p113_p3 }
   0xa   : > { %p3312_p7 = scmp.ge.s32.totalorder %s4103_s15, 1  ;;  %p143_p8 = scmp.lt.s32.totalorder %s4103_s15, 3 }
   0xc   : > { %p144_p9 = pnand %p3312_p7, %p143_p8 }
   0xe   : > { %147 = sbr.rel (%p144_p9) target bundleno = 572 (0x23c), region = 28 }
  0x13   : > { %v391_v0 = vld [vmem:[%s5405_s1 + $0x4] sm:$0xf]  ;;  %vm440_vm0 = vcmask 1043456   ;;  %vm215_vm1 = vcmask 64512   ;;  %vm218_vm2 = vcmask 58368   ;;  %v4105_v2 = vmov 0.0  }
  0x14   : > { %3993 = vmatprep.subr.msk.bf16.mxu0 %vm440_vm0, %v391_v0  ;;  %3994 = vmatprep.subr.msk.bf16.mxu1 %vm440_vm0, %v391_v0  ;;  %v442_v1 = vsel %vm440_vm0, %v391_v0, 0  ;;  %216 = vst.msk [vmem:[#allocation2] sm:$0xff] %vm215_vm1, %v4105_v2  ;;  %217 = vst.msk [vmem:[#allocation2 + $0x8] sm:$0xff] %vm215_vm1, %v4105_v2  ;;  %vm224_vm3 = vcmask 57344   ;;  %p172_p10 = scmp.lt.s32.totalorder %s4148_s16, 1  ;;  %vm2997_vm4 = vcmask 60416  }
  0x15   : > { %219 = vst.msk [vmem:[#allocation2 + $0x10] sm:$0x3] %vm218_vm2, %v4105_v2  ;;  %223 = vst.msk [vmem:[#allocation2 + $0x1a8] sm:$0x3] %vm218_vm2, %v4105_v2  ;;  %v4191_v3 = vld [vmem:[%s5405_s1] sm:$0xf]  ;;  %3686 = vmatpush3.bf16.msra.mxu0 %v442_v1  ;;  %3992 = vmatpush3.bf16.msra.mxu1 %v442_v1 }
  0x16   : > { %221 = vst.msk [vmem:[#allocation2 + $0x198] sm:$0xff] %vm215_vm1, %v4105_v2  ;;  %222 = vst.msk [vmem:[#allocation2 + $0x1a0] sm:$0xff] %vm215_vm1, %v4105_v2  ;;  %v865_v4 = vld [vmem:[%s5405_s1 + $0x8] sm:$0xf]  ;;  %s4235_s30 = scalar_select %p172_p10, %s4148_s16, 1  ;;  %3995 = vmatprep.subr.msk.bf16.mxu1 %vm440_vm0, %v4191_v3  ;;  %v654_v44 = vsel %vm440_vm0, %v4191_v3, 0 }
  0x17   : > { %225 = vst.msk [vmem:[#allocation2] sm:$0x1] %vm224_vm3, %v4105_v2  ;;  %243 = vst.msk [vmem:[#allocation2 + $0x11] sm:$0x1] %vm224_vm3, %v4105_v2  ;;  %3996 = vmatprep.subr.msk.bf16.mxu0 %vm440_vm0, %v865_v4  ;;  %v4294_v33 = vld [vmem:[%s5405_s1 + $0x10] sm:$0xf] }
  0x18   : > { %260 = vst.msk [vmem:[#allocation2 + $0x1a9] sm:$0x1] %vm224_vm3, %v4105_v2  ;;  %226 = vst.msk [vmem:[#allocation2 + $0x18] sm:$0x1] %vm224_vm3, %v4105_v2  ;;  %s3498_s4 = sshll.u32 %s4235_s30, 8  ;;  %v915_v36 = vsel %vm440_vm0, %v865_v4, 0 }
  0x19   : > { %227 = vst.msk [vmem:[#allocation2 + $0x30] sm:$0x1] %vm224_vm3, %v4105_v2  ;;  %228 = vst.msk [vmem:[#allocation2 + $0x48] sm:$0x1] %vm224_vm3, %v4105_v2  ;;  %s4244_s7 = scalar_lea.vmem %s5404_s0, %s3498_s4  ;;  %v4314_v47 = vld [vmem:[%s5405_s1 + $0xc] sm:$0xf] }
  0x1a   : > { %229 = vst.msk [vmem:[#allocation2 + $0x60] sm:$0x1] %vm224_vm3, %v4105_v2  ;;  %230 = vst.msk [vmem:[#allocation2 + $0x78] sm:$0x1] %vm224_vm3, %v4105_v2  ;;  %v183_v5 = vld [vmem:[%s4244_s7] sm:$0xff]  ;;  %v184_v6 = vld [vmem:[%s4244_s7 + $0x8] sm:$0xff] }
  0x1b   : > { %231 = vst.msk [vmem:[#allocation2 + $0x90] sm:$0x1] %vm224_vm3, %v4105_v2  ;;  %232 = vst.msk [vmem:[#allocation2 + $0xa8] sm:$0x1] %vm224_vm3, %v4105_v2  ;;  %v197_v7 = vld [vmem:[%s4244_s7 + $0x70] sm:$0xff]  ;;  %v343_v8 = vld [vmem:[#allocation2 + $0x1] sm:$0xff] }
  0x1c   : > { %233 = vst.msk [vmem:[#allocation2 + $0xc0] sm:$0x1] %vm224_vm3, %v4105_v2  ;;  %234 = vst.msk [vmem:[#allocation2 + $0xd8] sm:$0x1] %vm224_vm3, %v4105_v2  ;;  %v344_v9 = vld [vmem:[#allocation2 + $0x9] sm:$0xff]  ;;  %v198_v10 = vld [vmem:[%s4244_s7 + $0x78] sm:$0xff] }
  0x1d   : > { %235 = vst.msk [vmem:[#allocation2 + $0xf0] sm:$0x1] %vm224_vm3, %v4105_v2  ;;  %236 = vst.msk [vmem:[#allocation2 + $0x108] sm:$0x1] %vm224_vm3, %v4105_v2  ;;  %v375_v11 = vpack.c.bf16 %v344_v9, %v343_v8  ;;  %v199_v12 = vld [vmem:[%s4244_s7 + $0x80] sm:$0xff]  ;;  %v200_v13 = vld [vmem:[%s4244_s7 + $0x88] sm:$0xff] }
  0x1e   : > { %237 = vst.msk [vmem:[#allocation2 + $0x120] sm:$0x1] %vm224_vm3, %v4105_v2  ;;  %238 = vst.msk [vmem:[#allocation2 + $0x138] sm:$0x1] %vm224_vm3, %v4105_v2  ;;  %v185_v14 = vld [vmem:[%s4244_s7 + $0x10] sm:$0xff]  ;;  %v186_v15 = vld [vmem:[%s4244_s7 + $0x18] sm:$0xff] }
  0x1f   : > { %239 = vst.msk [vmem:[#allocation2 + $0x150] sm:$0x1] %vm224_vm3, %v4105_v2  ;;  %240 = vst.msk [vmem:[#allocation2 + $0x168] sm:$0x1] %vm224_vm3, %v4105_v2  ;;  %v187_v16 = vld [vmem:[%s4244_s7 + $0x20] sm:$0xff]  ;;  %v188_v17 = vld [vmem:[%s4244_s7 + $0x28] sm:$0xff]  ;;  %3687 = vmatprep.mubr.msk.bf16.mxu0 %vm215_vm1, %v375_v11 }
  0x20   : > { %241 = vst.msk [vmem:[#allocation2 + $0x180] sm:$0x1] %vm224_vm3, %v4105_v2  ;;  %244 = vst.msk [vmem:[#allocation2 + $0x29] sm:$0x1] %vm224_vm3, %v4105_v2  ;;  %v201_v18 = vld [vmem:[%s4244_s7 + $0x90] sm:$0xff]  ;;  %v202_v19 = vld [vmem:[%s4244_s7 + $0x98] sm:$0xff] }
  0x21   : > { %245 = vst.msk [vmem:[#allocation2 + $0x41] sm:$0x1] %vm224_vm3, %v4105_v2  ;;  %246 = vst.msk [vmem:[#allocation2 + $0x59] sm:$0x1] %vm224_vm3, %v4105_v2  ;;  %v203_v20 = vld [vmem:[%s4244_s7 + $0xa0] sm:$0xff]  ;;  %v204_v21 = vld [vmem:[%s4244_s7 + $0xa8] sm:$0xff] }
  0x22   : > { %247 = vst.msk [vmem:[#allocation2 + $0x71] sm:$0x1] %vm224_vm3, %v4105_v2  ;;  %248 = vst.msk [vmem:[#allocation2 + $0x89] sm:$0x1] %vm224_vm3, %v4105_v2  ;;  %v189_v22 = vld [vmem:[%s4244_s7 + $0x30] sm:$0xff]  ;;  %v190_v23 = vld [vmem:[%s4244_s7 + $0x38] sm:$0xff] }
  0x23   : > { %249 = vst.msk [vmem:[#allocation2 + $0xa1] sm:$0x1] %vm224_vm3, %v4105_v2  ;;  %250 = vst.msk [vmem:[#allocation2 + $0xb9] sm:$0x1] %vm224_vm3, %v4105_v2  ;;  %v191_v24 = vld [vmem:[%s4244_s7 + $0x40] sm:$0xff]  ;;  %v192_v25 = vld [vmem:[%s4244_s7 + $0x48] sm:$0xff] }
  0x24   : > { %251 = vst.msk [vmem:[#allocation2 + $0xd1] sm:$0x1] %vm224_vm3, %v4105_v2  ;;  %252 = vst.msk [vmem:[#allocation2 + $0xe9] sm:$0x1] %vm224_vm3, %v4105_v2  ;;  %v205_v26 = vld [vmem:[%s4244_s7 + $0xb0] sm:$0xff]  ;;  %v206_v27 = vld [vmem:[%s4244_s7 + $0xb8] sm:$0xff] }
  0x25   : > { %253 = vst.msk [vmem:[#allocation2 + $0x101] sm:$0x1] %vm224_vm3, %v4105_v2  ;;  %254 = vst.msk [vmem:[#allocation2 + $0x119] sm:$0x1] %vm224_vm3, %v4105_v2  ;;  %v207_v28 = vld [vmem:[%s4244_s7 + $0xc0] sm:$0xff]  ;;  %v208_v29 = vld [vmem:[%s4244_s7 + $0xc8] sm:$0xff] }
  0x26   : > { %255 = vst.msk [vmem:[#allocation2 + $0x131] sm:$0x1] %vm224_vm3, %v4105_v2  ;;  %256 = vst.msk [vmem:[#allocation2 + $0x149] sm:$0x1] %vm224_vm3, %v4105_v2  ;;  %v193_v37 = vld [vmem:[%s4244_s7 + $0x50] sm:$0xff]  ;;  %v194_v38 = vld [vmem:[%s4244_s7 + $0x58] sm:$0xff] }
  0x27   : > { %257 = vst.msk [vmem:[#allocation2 + $0x161] sm:$0x1] %vm224_vm3, %v4105_v2  ;;  %258 = vst.msk [vmem:[#allocation2 + $0x179] sm:$0x1] %vm224_vm3, %v4105_v2  ;;  %v195_v61 = vld [vmem:[%s4244_s7 + $0x60] sm:$0xff]  ;;  %v196_v62 = vld [vmem:[%s4244_s7 + $0x68] sm:$0xff] }
  0x28   : > { %259 = vst.msk [vmem:[#allocation2 + $0x191] sm:$0x1] %vm224_vm3, %v4105_v2  ;;  %242 = vst.msk [vmem:[#allocation2 + $0x198] sm:$0x1] %vm224_vm3, %v4105_v2  ;;  %v209_v63 = vld [vmem:[%s4244_s7 + $0xd0] sm:$0xff]  ;;  %v210_v1 = vld [vmem:[%s4244_s7 + $0xd8] sm:$0xff] }
  0x29   : > { %262 = vst.msk [vmem:[#allocation2 + $0x19] sm:$0xff] %vm215_vm1, %v183_v5  ;;  %263 = vst.msk [vmem:[#allocation2 + $0x21] sm:$0xff] %vm215_vm1, %v184_v6  ;;  %v211_v3 = vld [vmem:[%s4244_s7 + $0xe0] sm:$0xff]  ;;  %v212_v4 = vld [vmem:[%s4244_s7 + $0xe8] sm:$0xff]  ;;  %s3499_s29 = sshll.u32 %s4235_s30, 7  ;;  %s169_s6 = sand.u32 1, %s4095_s13  }
  0x2a   : > { %276 = vst.msk [vmem:[#allocation2 + $0xc1] sm:$0xff] %vm215_vm1, %v197_v7  ;;  %277 = vst.msk [vmem:[#allocation2 + $0xc9] sm:$0xff] %vm215_vm1, %v198_v10  ;;  %s5143_s5 = scalar_lea.vmem %s5406_s2, %s3499_s29  ;;  %s3495_s8 = sshll.u32 %s4148_s16, 5  ;;  %vm3200_vm5 = vcmask 1040384  }
  0x2b   : > { %278 = vst.msk [vmem:[#allocation2 + $0xd9] sm:$0xff] %vm215_vm1, %v199_v12  ;;  %279 = vst.msk [vmem:[#allocation2 + $0xe1] sm:$0xff] %vm215_vm1, %v200_v13  ;;  %s5368_s19 = scalar_lea.hbm %s5407_s3, %s3495_s8  ;;  %s3209_s20 = scalar_lea.sflag [#allocation4], %s169_s6 }
  0x2c   : > { %264 = vst.msk [vmem:[#allocation2 + $0x31] sm:$0xff] %vm215_vm1, %v185_v14  ;;  %265 = vst.msk [vmem:[#allocation2 + $0x39] sm:$0xff] %vm215_vm1, %v186_v15  ;;  %s4106_s16 = smov [#allocation3]  }
  0x2d   : > { %266 = vst.msk [vmem:[#allocation2 + $0x49] sm:$0xff] %vm215_vm1, %v187_v16  ;;  %267 = vst.msk [vmem:[#allocation2 + $0x51] sm:$0xff] %vm215_vm1, %v188_v17  ;;  %s4047_s25 = sshll.u32 %s4106_s16, 4  ;;  %s4048_s25 = int_to_ptr.vmem [resolvable:$false] %s4047_s25 }
  0x2e   : > { %280 = vst.msk [vmem:[#allocation2 + $0xf1] sm:$0xff] %vm215_vm1, %v201_v18  ;;  %281 = vst.msk [vmem:[#allocation2 + $0xf9] sm:$0xff] %vm215_vm1, %v202_v19  ;;  %v817_v19 = vld [vmem:[#allocation2 + $0x2] sm:$0xff]  ;;  %s4049_s26 = scalar_lea.vmem %s4048_s25, 64 }
  0x2f   : > { %282 = vst.msk [vmem:[#allocation2 + $0x109] sm:$0xff] %vm215_vm1, %v203_v20  ;;  %283 = vst.msk [vmem:[#allocation2 + $0x111] sm:$0xff] %vm215_vm1, %v204_v21  ;;  %v818_v20 = vld [vmem:[#allocation2 + $0xa] sm:$0xff] }
  0x30   : > { %268 = vst.msk [vmem:[#allocation2 + $0x61] sm:$0xff] %vm215_vm1, %v189_v22  ;;  %269 = vst.msk [vmem:[#allocation2 + $0x69] sm:$0xff] %vm215_vm1, %v190_v23  ;;  %v345_v30 = vld [vmem:[#allocation2 + $0x19] sm:$0xff]  ;;  %v346_v31 = vld [vmem:[#allocation2 + $0x21] sm:$0xff] }
  0x31   : > { %270 = vst.msk [vmem:[#allocation2 + $0x79] sm:$0xff] %vm215_vm1, %v191_v24  ;;  %271 = vst.msk [vmem:[#allocation2 + $0x81] sm:$0xff] %vm215_vm1, %v192_v25  ;;  %v359_v32 = vld [vmem:[#allocation2 + $0xc1] sm:$0xff]  ;;  %v4296_v34 = vpack.c.bf16 %v346_v31, %v345_v30  ;;  %v360_v35 = vld [vmem:[#allocation2 + $0xc9] sm:$0xff] }
  0x32   : > { %284 = vst.msk [vmem:[#allocation2 + $0x121] sm:$0xff] %vm215_vm1, %v205_v26  ;;  %285 = vst.msk [vmem:[#allocation2 + $0x129] sm:$0xff] %vm215_vm1, %v206_v27  ;;  %v4301_v39 = vpack.c.bf16 %v360_v35, %v359_v32  ;;  %v361_v40 = vld [vmem:[#allocation2 + $0xd9] sm:$0xff]  ;;  %v362_v41 = vld [vmem:[#allocation2 + $0xe1] sm:$0xff]  ;;  %v849_v26 = vpack.c.bf16 %v818_v20, %v817_v19 }
  0x33   : > { %286 = vst.msk [vmem:[#allocation2 + $0x139] sm:$0xff] %vm215_vm1, %v207_v28  ;;  %287 = vst.msk [vmem:[#allocation2 + $0x141] sm:$0xff] %vm215_vm1, %v208_v29  ;;  %v347_v42 = vld [vmem:[#allocation2 + $0x31] sm:$0xff]  ;;  %3688 = vmatmul.mubr.msk.bf16.vlgmr.msra.gmra.mxu0 %vm215_vm1, %v4296_v34  ;;  %v4307_v43 = vpack.c.bf16 %v362_v41, %v361_v40  ;;  %v348_v45 = vld [vmem:[#allocation2 + $0x39] sm:$0xff] }
  0x34   : > { %272 = vst.msk [vmem:[#allocation2 + $0x91] sm:$0xff] %vm215_vm1, %v193_v37  ;;  %273 = vst.msk [vmem:[#allocation2 + $0x99] sm:$0xff] %vm215_vm1, %v194_v38  ;;  %v349_v46 = vld [vmem:[#allocation2 + $0x49] sm:$0xff]  ;;  %3703 = vmatprep.mubr.msk.bf16.mxu1 %vm215_vm1, %v4301_v39  ;;  %3754 = vmatpush3.bf16.msra.mxu0 %v915_v36  ;;  %v4318_v48 = vpack.c.bf16 %v348_v45, %v347_v42  ;;  %v350_v49 = vld [vmem:[#allocation2 + $0x51] sm:$0xff] }
  0x35   : > { %v363_v50 = vld [vmem:[#allocation2 + $0xf1] sm:$0xff]  ;;  %v364_v51 = vld [vmem:[#allocation2 + $0xf9] sm:$0xff]  ;;  %3704 = vmatmul.mubr.msk.bf16.vlgmr.msra.gmra.mxu1 %vm215_vm1, %v4307_v43  ;;  %3998 = vmatprep.subr.msk.bf16.mxu0 %vm440_vm0, %v4294_v33  ;;  %v4328_v57 = vpack.c.bf16 %v350_v49, %v349_v46  ;;  %274 = vst.msk [vmem:[#allocation2 + $0xa9] sm:$0xff] %vm215_vm1, %v195_v61  ;;  %275 = vst.msk [vmem:[#allocation2 + $0xb1] sm:$0xff] %vm215_vm1, %v196_v62 }
  0x36   : > { %v4322_v52 = vpack.c.bf16 %v364_v51, %v363_v50  ;;  %3720 = vmatpush3.bf16.msra.mxu1 %v654_v44  ;;  %3691 = vmatprep.mubr.msk.bf16.mxu0 %vm215_vm1, %v4318_v48  ;;  %v365_v55 = vld [vmem:[#allocation2 + $0x109] sm:$0xff]  ;;  %v366_v56 = vld [vmem:[#allocation2 + $0x111] sm:$0xff]  ;;  %288 = vst.msk [vmem:[#allocation2 + $0x151] sm:$0xff] %vm215_vm1, %v209_v63  ;;  %289 = vst.msk [vmem:[#allocation2 + $0x159] sm:$0xff] %vm215_vm1, %v210_v1  ;;  %v1501_v44 = vsel %vm440_vm0, %v4294_v33, 0  ;;  %v1208_v51 = vsel %vm440_vm0, %v4314_v47, 0 }
  0x37   : > { %v351_v53 = vld [vmem:[#allocation2 + $0x61] sm:$0xff]  ;;  %v352_v54 = vld [vmem:[#allocation2 + $0x69] sm:$0xff]  ;;  %3997 = vmatprep.subr.msk.bf16.mxu1 %vm440_vm0, %v4314_v47  ;;  %v4339_v0 = vpack.c.bf16 %v366_v56, %v365_v55  ;;  %290 = vst.msk [vmem:[#allocation2 + $0x169] sm:$0xff] %vm215_vm1, %v211_v3  ;;  %291 = vst.msk [vmem:[#allocation2 + $0x171] sm:$0xff] %vm215_vm1, %v212_v4 }
  0x38   : > { %3707 = vmatprep.mubr.msk.bf16.mxu1 %vm215_vm1, %v4322_v52  ;;  %v4334_v60 = vpack.c.bf16 %v352_v54, %v351_v53  ;;  %v353_v5 = vld [vmem:[#allocation2 + $0x79] sm:$0xff]  ;;  %v354_v6 = vld [vmem:[#allocation2 + $0x81] sm:$0xff]  ;;  %v298_v38 = vld [vmem:[#allocation2 + $0x30] sm:$0xff] }
  0x39   : > { %v367_v58 = vld [vmem:[#allocation2 + $0x121] sm:$0xff]  ;;  %v368_v59 = vld [vmem:[#allocation2 + $0x129] sm:$0xff]  ;;  %v4360_v11 = vpack.c.bf16 %v354_v6, %v353_v5  ;;  %v821_v31 = vld [vmem:[#allocation2 + $0x32] sm:$0xff] }
  0x3a   : > { %v4345_v2 = vpack.c.bf16 %v368_v59, %v367_v58  ;;  %v369_v9 = vld [vmem:[#allocation2 + $0x139] sm:$0xff]  ;;  %v370_v10 = vld [vmem:[#allocation2 + $0x141] sm:$0xff]  ;;  %v213_v49 = vld [vmem:[%s4244_s7 + $0xf0] sm:$0xff] }
  0x3b   : > { %3692 = vmatmul.mubr.msk.bf16.gmra.mxu0 %vm215_vm1, %v4328_v57  ;;  %v355_v7 = vld [vmem:[#allocation2 + $0x91] sm:$0xff]  ;;  %v356_v8 = vld [vmem:[#allocation2 + $0x99] sm:$0xff]  ;;  %v4364_v14 = vpack.c.bf16 %v370_v10, %v369_v9  ;;  %v295_v25 = vld [vmem:[#allocation2 + $0x8] sm:$0xff]  ;;  %292 = vst.msk [vmem:[#allocation2 + $0x181] sm:$0xff] %vm215_vm1, %v213_v49 }
  0x3c   : > { %3695 = vmatprep.mubr.msk.bf16.mxu0 %vm215_vm1, %v4334_v60  ;;  %v4362_v12 = vpack.c.bf16 %v356_v8, %v355_v7  ;;  %v357_v17 = vld [vmem:[#allocation2 + $0xa9] sm:$0xff]  ;;  %v358_v18 = vld [vmem:[#allocation2 + $0xb1] sm:$0xff]  ;;  %v294_v24 = vld [vmem:[#allocation2] sm:$0xff] }
  0x3d   : > { %3708 = vmatmul.mubr.msk.bf16.gmra.mxu1 %vm215_vm1, %v4339_v0  ;;  %v371_v13 = vld [vmem:[#allocation2 + $0x151] sm:$0xff]  ;;  %v372_v15 = vld [vmem:[#allocation2 + $0x159] sm:$0xff]  ;;  %v4376_v23 = vpack.c.bf16 %v358_v18, %v357_v17  ;;  %v326_v28 = vpack.c.bf16 %v295_v25, %v294_v24  ;;  %v820_v30 = vld [vmem:[#allocation2 + $0x22] sm:$0xff] }
  0x3e   : > { %3711 = vmatprep.mubr.msk.bf16.mxu1 %vm215_vm1, %v4345_v2  ;;  %v4366_v16 = vpack.c.bf16 %v372_v15, %v371_v13  ;;  %v373_v21 = vld [vmem:[#allocation2 + $0x169] sm:$0xff]  ;;  %v374_v22 = vld [vmem:[#allocation2 + $0x171] sm:$0xff]  ;;  %v819_v29 = vld [vmem:[#allocation2 + $0x1a] sm:$0xff] }
  0x3f   : > { %v4378_v27 = vpack.c.bf16 %v374_v22, %v373_v21  ;;  %v822_v32 = vld [vmem:[#allocation2 + $0x3a] sm:$0xff]  ;;  %v4386_v37 = vpack.c.bf16 %v820_v30, %v819_v29  ;;  %v823_v33 = vld [vmem:[#allocation2 + $0x4a] sm:$0xff]  ;;  %v824_v53 = vld [vmem:[#allocation2 + $0x52] sm:$0xff] }
  0x40   : > { %v296_v35 = vld [vmem:[#allocation2 + $0x18] sm:$0xff]  ;;  %v297_v36 = vld [vmem:[#allocation2 + $0x20] sm:$0xff]  ;;  %v4388_v41 = vpack.c.bf16 %v822_v32, %v821_v31  ;;  %v4414_v54 = vld [vmem:[%s5405_s1 + $0x14] sm:$0xf]  ;;  %v4422_v59 = vpack.c.bf16 %v824_v53, %v823_v33 }
  0x41   : > { %v299_v40 = vld [vmem:[#allocation2 + $0x38] sm:$0xff]  ;;  %v4390_v42 = vpack.c.bf16 %v297_v36, %v296_v35  ;;  %v825_v55 = vld [vmem:[#allocation2 + $0x62] sm:$0xff]  ;;  %v826_v47 = vld [vmem:[#allocation2 + $0x6a] sm:$0xff] }
  0x42   : > { %v4394_v45 = vpack.c.bf16 %v299_v40, %v298_v38  ;;  %v4399_v46 = vld [vmem:[%s5405_s1 + $0x18] sm:$0xf]  ;;  %v300_v56 = vld [vmem:[#allocation2 + $0x48] sm:$0xff]  ;;  %v301_v58 = vld [vmem:[#allocation2 + $0x50] sm:$0xff]  ;;  %v4426_v63 = vpack.c.bf16 %v826_v47, %v825_v55 }
  0x43   : > { %3696 = vmatmul.mubr.msk.bf16.gmra.mxu0 %vm215_vm1, %v4360_v11  ;;  %v214_v50 = vld [vmem:[%s4244_s7 + $0xf8] sm:$0xff]  ;;  %v302_v61 = vld [vmem:[#allocation2 + $0x60] sm:$0xff]  ;;  %v303_v62 = vld [vmem:[#allocation2 + $0x68] sm:$0xff]  ;;  %v4428_v1 = vpack.c.bf16 %v301_v58, %v300_v56  ;;  %s3313_s7 = sshll.u32 %s169_s6, 1 }
  0x44   : > { %3699 = vmatprep.mubr.msk.bf16.mxu0 %vm215_vm1, %v4362_v12  ;;  %293 = vst.msk [vmem:[#allocation2 + $0x189] sm:$0xff] %vm215_vm1, %v214_v50  ;;  %v4430_v3 = vpack.c.bf16 %v303_v62, %v302_v61  ;;  %v827_v4 = vld [vmem:[#allocation2 + $0x7a] sm:$0xff]  ;;  %v828_v5 = vld [vmem:[#allocation2 + $0x82] sm:$0xff]  ;;  %v829_v6 = vld [vmem:[#allocation2 + $0x92] sm:$0xff]  ;;  %s171_s9 = scalar_lea.vmem [#allocation3], %s3313_s7 }
  0x45   : > { %3712 = vmatmul.mubr.msk.bf16.gmra.mxu1 %vm215_vm1, %v4364_v14  ;;  %v830_v7 = vld [vmem:[#allocation2 + $0x9a] sm:$0xff]  ;;  %v4440_v10 = vpack.c.bf16 %v828_v5, %v827_v4  ;;  %v306_v13 = vld [vmem:[#allocation2 + $0x90] sm:$0xff]  ;;  %v833_v22 = vld [vmem:[#allocation2 + $0xc2] sm:$0xff]  ;;  %s3225_s10 = sshll.u32 %s171_s9, 4  ;;  %s3226_s10 = int_to_ptr.vmem [resolvable:$true] %s3225_s10 }
  0x46   : > { %3715 = vmatprep.mubr.msk.bf16.mxu1 %vm215_vm1, %v4366_v16  ;;  %v304_v8 = vld [vmem:[#allocation2 + $0x78] sm:$0xff]  ;;  %v305_v9 = vld [vmem:[#allocation2 + $0x80] sm:$0xff]  ;;  %v4442_v17 = vpack.c.bf16 %v830_v7, %v829_v6  ;;  %v831_v20 = vld [vmem:[#allocation2 + $0xaa] sm:$0xff]  ;;  %s4043_s24 = scalar_lea.vmem %s3226_s10, 32  ;;  %p4050_p0 = scmp.lt.s32.totalorder %s3226_s10, %s4048_s25 }
  0x47   : > { %v307_v15 = vld [vmem:[#allocation2 + $0x98] sm:$0xff]  ;;  %v4444_v18 = vpack.c.bf16 %v305_v9, %v304_v8  ;;  %v834_v24 = vld [vmem:[#allocation2 + $0xca] sm:$0xff]  ;;  %v310_v29 = vld [vmem:[#allocation2 + $0xc0] sm:$0xff]  ;;  %p4044_p11 = scmp.ne.s32.totalorder %s3226_s10, %s4043_s24  ;;  %p4051_p1 = scmp.lt.s32.totalorder %s4049_s26, %s4043_s24 }
  0x48   : > { %v4446_v19 = vpack.c.bf16 %v307_v15, %v306_v13  ;;  %v832_v21 = vld [vmem:[#allocation2 + $0xb2] sm:$0xff]  ;;  %v308_v25 = vld [vmem:[#allocation2 + $0xa8] sm:$0xff]  ;;  %v4458_v31 = vpack.c.bf16 %v834_v24, %v833_v22  ;;  %v835_v36 = vld [vmem:[#allocation2 + $0xda] sm:$0xff] }
  0x49   : > { %v311_v30 = vld [vmem:[#allocation2 + $0xc8] sm:$0xff]  ;;  %v837_v40 = vld [vmem:[#allocation2 + $0xf2] sm:$0xff]  ;;  %v313_v50 = vld [vmem:[#allocation2 + $0xe0] sm:$0xff]  ;;  %p4045_p12 = pnand %p4044_p11, %p4165_p5  ;;  %p4052_p2 = por %p4051_p1, %p4050_p0 }
  0x4a   : > { %v4462_v35 = vpack.c.bf16 %v311_v30, %v310_v29  ;;  %v836_v38 = vld [vmem:[#allocation2 + $0xe2] sm:$0xff]  ;;  %v312_v49 = vld [vmem:[#allocation2 + $0xd8] sm:$0xff]  ;;  %v314_v33 = vld [vmem:[#allocation2 + $0xf0] sm:$0xff] }
  0x4b   : > { %3700 = vmatmul.mubr.msk.bf16.gmra.mxu0 %vm215_vm1, %v4376_v23  ;;  %v315_v53 = vld [vmem:[#allocation2 + $0xf8] sm:$0xff]  ;;  %v4476_v47 = vpack.c.bf16 %v313_v50, %v312_v49  ;;  %v839_v58 = vld [vmem:[#allocation2 + $0x10a] sm:$0xff]  ;;  %v841_v62 = vld [vmem:[#allocation2 + $0x122] sm:$0xff]  ;;  %p4046_p13 = pneg %p4045_p12 }
  0x4c   : > { %3755 = vmatprep.mubr.msk.bf16.mxu0 %vm215_vm1, %v849_v26  ;;  %v309_v26 = vld [vmem:[#allocation2 + $0xb0] sm:$0xff]  ;;  %v4478_v56 = vpack.c.bf16 %v315_v53, %v314_v33  ;;  %v316_v5 = vld [vmem:[#allocation2 + $0x108] sm:$0xff]  ;;  %v318_v8 = vld [vmem:[#allocation2 + $0x120] sm:$0xff] }
  0x4d   : > { %3716 = vmatmul.mubr.msk.bf16.gmra.mxu1 %vm215_vm1, %v4378_v27  ;;  %v4460_v32 = vpack.c.bf16 %v309_v26, %v308_v25  ;;  %v840_v61 = vld [vmem:[#allocation2 + $0x112] sm:$0xff]  ;;  %v842_v4 = vld [vmem:[#allocation2 + $0x12a] sm:$0xff]  ;;  %v844_v22 = vld [vmem:[#allocation2 + $0x142] sm:$0xff]  ;;  %p4053_p3 = pnand %p4052_p2, %p4046_p13 }
  0x4e   : > { %3721 = vmatprep.mubr.msk.bf16.mxu1 %vm215_vm1, %v326_v28  ;;  %v4456_v28 = vpack.c.bf16 %v832_v21, %v831_v20  ;;  %v317_v6 = vld [vmem:[#allocation2 + $0x110] sm:$0xff]  ;;  %v4488_v7 = vpack.c.bf16 %v840_v61, %v839_v58  ;;  %v319_v9 = vld [vmem:[#allocation2 + $0x128] sm:$0xff]  ;;  %v4490_v13 = vpack.c.bf16 %v842_v4, %v841_v62  ;;  %v843_v21 = vld [vmem:[#allocation2 + $0x13a] sm:$0xff]  ;;  %v2088_v4 = vsel %vm440_vm0, %v4399_v46, 0 }
  0x4f   : > { %v4492_v15 = vpack.c.bf16 %v317_v6, %v316_v5  ;;  %v4494_v20 = vpack.c.bf16 %v319_v9, %v318_v8  ;;  %v845_v24 = vld [vmem:[#allocation2 + $0x152] sm:$0xff]  ;;  %v846_v25 = vld [vmem:[#allocation2 + $0x15a] sm:$0xff]  ;;  %v4504_v30 = vpack.c.bf16 %v844_v22, %v843_v21  ;;  %v847_v50 = vld [vmem:[#allocation2 + $0x16a] sm:$0xff]  ;;  %v1794_v6 = vsel %vm440_vm0, %v4414_v54, 0 }
  0x50   : > { %v320_v26 = vld [vmem:[#allocation2 + $0x138] sm:$0xff]  ;;  %v321_v29 = vld [vmem:[#allocation2 + $0x140] sm:$0xff]  ;;  %v324_v53 = vld [vmem:[#allocation2 + $0x168] sm:$0xff] }
  0x51   : > { %v848_v33 = vld [vmem:[#allocation2 + $0x172] sm:$0xff]  ;;  %v2624_v5 = vld [vmem:[%s5405_s1 + $0x20] sm:$0xf] }
  0x52   : > { %v325_v58 = vld [vmem:[#allocation2 + $0x170] sm:$0xff]  ;;  %v4520_v61 = vpack.c.bf16 %v848_v33, %v847_v50 }
  0x53   : > { %3756 = vmatmul.mubr.msk.bf16.vlgmr.msra.gmra.mxu0 %vm215_vm1, %v4386_v37  ;;  %v4522_v62 = vpack.c.bf16 %v325_v58, %v324_v53  ;;  %v2285_v58 = vld [vmem:[#allocation2 + $0x49] sm:$0xff] }
  0x54   : > { %3822 = vmatpush3.bf16.msra.mxu0 %v1501_v44  ;;  %3759 = vmatprep.mubr.msk.bf16.mxu0 %vm215_vm1, %v4388_v41  ;;  %v838_v44 = vld [vmem:[#allocation2 + $0xfa] sm:$0xff] }
  0x55   : > { %3722 = vmatmul.mubr.msk.bf16.vlgmr.msra.gmra.mxu1 %vm215_vm1, %v4390_v42  ;;  %4000 = vmatprep.subr.msk.bf16.mxu0 %vm440_vm0, %v4399_v46  ;;  %v4474_v55 = vpack.c.bf16 %v838_v44, %v837_v40  ;;  %v4506_v40 = vpack.c.bf16 %v846_v25, %v845_v24  ;;  %v4508_v44 = vpack.c.bf16 %v321_v29, %v320_v26  ;;  %v2283_v25 = vld [vmem:[#allocation2 + $0x31] sm:$0xff]  ;;  %v2284_v26 = vld [vmem:[#allocation2 + $0x39] sm:$0xff] }
  0x56   : > { %3788 = vmatpush3.bf16.msra.mxu1 %v1208_v51  ;;  %3725 = vmatprep.mubr.msk.bf16.mxu1 %vm215_vm1, %v4394_v45  ;;  %v4472_v51 = vpack.c.bf16 %v836_v38, %v835_v36  ;;  %v322_v36 = vld [vmem:[#allocation2 + $0x150] sm:$0xff]  ;;  %v323_v38 = vld [vmem:[#allocation2 + $0x158] sm:$0xff] }
  0x57   : > { %3999 = vmatprep.subr.msk.bf16.mxu1 %vm440_vm0, %v4414_v54  ;;  %v4510_v49 = vpack.c.bf16 %v323_v38, %v322_v36 }
  0x5b   : > { %3760 = vmatmul.mubr.msk.bf16.gmra.mxu0 %vm215_vm1, %v4422_v59 }
  0x5c   : > { %3763 = vmatprep.mubr.msk.bf16.mxu0 %vm215_vm1, %v4426_v63 }
  0x5d   : > { %3726 = vmatmul.mubr.msk.bf16.gmra.mxu1 %vm215_vm1, %v4428_v1 }
  0x5e   : > { %3729 = vmatprep.mubr.msk.bf16.mxu1 %vm215_vm1, %v4430_v3 }
  0x63   : > { %3764 = vmatmul.mubr.msk.bf16.gmra.mxu0 %vm215_vm1, %v4440_v10 }
  0x64   : > { %3767 = vmatprep.mubr.msk.bf16.mxu0 %vm215_vm1, %v4442_v17 }
  0x65   : > { %3730 = vmatmul.mubr.msk.bf16.gmra.mxu1 %vm215_vm1, %v4444_v18 }
  0x66   : > { %3733 = vmatprep.mubr.msk.bf16.mxu1 %vm215_vm1, %v4446_v19 }
  0x6b   : > { %3768 = vmatmul.mubr.msk.bf16.gmra.mxu0 %vm215_vm1, %v4456_v28 }
  0x6c   : > { %3771 = vmatprep.mubr.msk.bf16.mxu0 %vm215_vm1, %v4458_v31 }
  0x6d   : > { %3734 = vmatmul.mubr.msk.bf16.gmra.mxu1 %vm215_vm1, %v4460_v32 }
  0x6e   : > { %3737 = vmatprep.mubr.msk.bf16.mxu1 %vm215_vm1, %v4462_v35 }
  0x73   : > { %3772 = vmatmul.mubr.msk.bf16.gmra.mxu0 %vm215_vm1, %v4472_v51 }
  0x74   : > { %3775 = vmatprep.mubr.msk.bf16.mxu0 %vm215_vm1, %v4474_v55 }
  0x75   : > { %3738 = vmatmul.mubr.msk.bf16.gmra.mxu1 %vm215_vm1, %v4476_v47 }
  0x76   : > { %3741 = vmatprep.mubr.msk.bf16.mxu1 %vm215_vm1, %v4478_v56 }
  0x7b   : > { %3776 = vmatmul.mubr.msk.bf16.gmra.mxu0 %vm215_vm1, %v4488_v7 }
  0x7c   : > { %3779 = vmatprep.mubr.msk.bf16.mxu0 %vm215_vm1, %v4490_v13 }
  0x7d   : > { %3742 = vmatmul.mubr.msk.bf16.gmra.mxu1 %vm215_vm1, %v4492_v15 }
  0x7e   : > { %3745 = vmatprep.mubr.msk.bf16.mxu1 %vm215_vm1, %v4494_v20 }
  0x83   : > { %3780 = vmatmul.mubr.msk.bf16.gmra.mxu0 %vm215_vm1, %v4504_v30 }
  0x84   : > { %3783 = vmatprep.mubr.msk.bf16.mxu0 %vm215_vm1, %v4506_v40 }
  0x85   : > { %3746 = vmatmul.mubr.msk.bf16.gmra.mxu1 %vm215_vm1, %v4508_v44 }
  0x86   : > { %3749 = vmatprep.mubr.msk.bf16.mxu1 %vm215_vm1, %v4510_v49 }
  0x8b   : > { %3784 = vmatmul.mubr.msk.bf16.gmra.mxu0 %vm215_vm1, %v4520_v61 }
  0x8c   : > { %3823 = vmatprep.mubr.msk.bf16.mxu0 %vm215_vm1, %v4296_v34  ;;  %v2331_v34 = vld [vmem:[%s5405_s1 + $0x1c] sm:$0xf] }
  0x8d   : > { %3750 = vmatmul.mubr.msk.bf16.gmra.mxu1 %vm215_vm1, %v4522_v62 }
  0x8e   : > { %3789 = vmatprep.mubr.msk.bf16.mxu1 %vm215_vm1, %v4390_v42 }
  0x93   : > { %3824 = vmatmul.mubr.msk.bf16.vlgmr.msra.gmra.mxu0 %vm215_vm1, %v4318_v48  ;;  %v1140_v48 = vld [vmem:[#allocation2 + $0x180] sm:$0xff] }
  0x94   : > { %3890 = vmatpush3.bf16.msra.mxu0 %v2088_v4  ;;  %3827 = vmatprep.mubr.msk.bf16.mxu0 %vm215_vm1, %v4328_v57 }
  0x95   : > { %3790 = vmatmul.mubr.msk.bf16.vlgmr.msra.gmra.mxu1 %vm215_vm1, %v4394_v45  ;;  %4002 = vmatprep.subr.msk.bf16.mxu0 %vm440_vm0, %v2624_v5 }
  0x96   : > { %3856 = vmatpush3.bf16.msra.mxu1 %v1794_v6  ;;  %3793 = vmatprep.mubr.msk.bf16.mxu1 %vm215_vm1, %v4428_v1  ;;  %v2287_v6 = vld [vmem:[#allocation2 + $0x61] sm:$0xff] }
  0x97   : > { %4001 = vmatprep.subr.msk.bf16.mxu1 %vm440_vm0, %v2331_v34 }
  0x9b   : > { %3828 = vmatmul.mubr.msk.bf16.gmra.mxu0 %vm215_vm1, %v4334_v60 }
  0x9c   : > { %3831 = vmatprep.mubr.msk.bf16.mxu0 %vm215_vm1, %v4360_v11 }
  0x9d   : > { %3794 = vmatmul.mubr.msk.bf16.gmra.mxu1 %vm215_vm1, %v4430_v3 }
  0x9e   : > { %3797 = vmatprep.mubr.msk.bf16.mxu1 %vm215_vm1, %v4444_v18 }
  0xa3   : > { %3832 = vmatmul.mubr.msk.bf16.gmra.mxu0 %vm215_vm1, %v4362_v12 }
  0xa4   : > { %3835 = vmatprep.mubr.msk.bf16.mxu0 %vm215_vm1, %v4376_v23 }
  0xa5   : > { %3798 = vmatmul.mubr.msk.bf16.gmra.mxu1 %vm215_vm1, %v4446_v19 }
  0xa6   : > { %3801 = vmatprep.mubr.msk.bf16.mxu1 %vm215_vm1, %v4460_v32 }
  0xab   : > { %3836 = vmatmul.mubr.msk.bf16.gmra.mxu0 %vm215_vm1, %v4301_v39  ;;  %v1433_v39 = vld [vmem:[#allocation2 + $0x181] sm:$0xff] }
  0xac   : > { %3839 = vmatprep.mubr.msk.bf16.mxu0 %vm215_vm1, %v4307_v43  ;;  %v1434_v43 = vld [vmem:[#allocation2 + $0x189] sm:$0xff] }
  0xad   : > { %3802 = vmatmul.mubr.msk.bf16.gmra.mxu1 %vm215_vm1, %v4462_v35  ;;  %v4600_v57 = vpack.c.bf16 %v1434_v43, %v1433_v39 }
  0xae   : > { %3805 = vmatprep.mubr.msk.bf16.mxu1 %vm215_vm1, %v4476_v47 }
  0xb3   : > { %3840 = vmatmul.mubr.msk.bf16.gmra.mxu0 %vm215_vm1, %v4322_v52  ;;  %v1141_v52 = vld [vmem:[#allocation2 + $0x188] sm:$0xff] }
  0xb4   : > { %3843 = vmatprep.mubr.msk.bf16.mxu0 %vm215_vm1, %v4339_v0  ;;  %v1157_v60 = vpack.c.bf16 %v1141_v52, %v1140_v48  ;;  %v2674_v0 = vsel %vm440_vm0, %v2624_v5, 0 }
  0xb5   : > { %3806 = vmatmul.mubr.msk.bf16.gmra.mxu1 %vm215_vm1, %v4478_v56 }
  0xb6   : > { %3809 = vmatprep.mubr.msk.bf16.mxu1 %vm215_vm1, %v4492_v15 }
  0xbb   : > { %3844 = vmatmul.mubr.msk.bf16.gmra.mxu0 %vm215_vm1, %v4345_v2  ;;  %v2381_v2 = vsel %vm440_vm0, %v2331_v34, 0  ;;  %v2288_v34 = vld [vmem:[#allocation2 + $0x69] sm:$0xff] }
  0xbc   : > { %3847 = vmatprep.mubr.msk.bf16.mxu0 %vm215_vm1, %v4364_v14  ;;  %v2317_v48 = vpack.c.bf16 %v2288_v34, %v2287_v6 }
  0xbd   : > { %3810 = vmatmul.mubr.msk.bf16.gmra.mxu1 %vm215_vm1, %v4494_v20 }
  0xbe   : > { %3813 = vmatprep.mubr.msk.bf16.mxu1 %vm215_vm1, %v4508_v44 }
  0xc3   : > { %3848 = vmatmul.mubr.msk.bf16.gmra.mxu0 %vm215_vm1, %v4366_v16 }
  0xc4   : > { %3851 = vmatprep.mubr.msk.bf16.mxu0 %vm215_vm1, %v4378_v27 }
  0xc5   : > { %3814 = vmatmul.mubr.msk.bf16.gmra.mxu1 %vm215_vm1, %v4510_v49 }
  0xc6   : > { %3817 = vmatprep.mubr.msk.bf16.mxu1 %vm215_vm1, %v4522_v62 }
  0xcb   : > { %3852 = vmatmul.mubr.msk.bf16.gmra.mxu0 %vm215_vm1, %v4600_v57 }
  0xcc   : > { %3891 = vmatprep.mubr.msk.bf16.mxu0 %vm215_vm1, %v4394_v45 }
  0xcd   : > { %3818 = vmatmul.mubr.msk.bf16.gmra.mxu1 %vm215_vm1, %v1157_v60 }
  0xce   : > { %3857 = vmatprep.mubr.msk.bf16.mxu1 %vm215_vm1, %v4386_v37 }
  0xd3   : > { %3892 = vmatmul.mubr.msk.bf16.vlgmr.msra.gmra.mxu0 %vm215_vm1, %v4428_v1 }
  0xd4   : > { %3958 = vmatpush3.bf16.msra.mxu0 %v2674_v0  ;;  %3895 = vmatprep.mubr.msk.bf16.mxu0 %vm215_vm1, %v4430_v3 }
  0xd5   : > { %3858 = vmatmul.mubr.msk.bf16.vlgmr.msra.gmra.mxu1 %vm215_vm1, %v4388_v41 }
  0xd6   : > { %3924 = vmatpush3.bf16.msra.mxu1 %v2381_v2  ;;  %3861 = vmatprep.mubr.msk.bf16.mxu1 %vm215_vm1, %v4422_v59 }
  0xdb   : > { %3896 = vmatmul.mubr.msk.bf16.gmra.mxu0 %vm215_vm1, %v4444_v18 }
  0xdc   : > { %3899 = vmatprep.mubr.msk.bf16.mxu0 %vm215_vm1, %v4446_v19 }
  0xdd   : > { %3862 = vmatmul.mubr.msk.bf16.gmra.mxu1 %vm215_vm1, %v4426_v63 }
  0xde   : > { %3865 = vmatprep.mubr.msk.bf16.mxu1 %vm215_vm1, %v4440_v10 }
  0xe3   : > { %3900 = vmatmul.mubr.msk.bf16.gmra.mxu0 %vm215_vm1, %v4460_v32 }
  0xe4   : > { %3903 = vmatprep.mubr.msk.bf16.mxu0 %vm215_vm1, %v4462_v35 }
  0xe5   : > { %3866 = vmatmul.mubr.msk.bf16.gmra.mxu1 %vm215_vm1, %v4442_v17 }
  0xe6   : > { %3869 = vmatprep.mubr.msk.bf16.mxu1 %vm215_vm1, %v4456_v28 }
  0xeb   : > { %3904 = vmatmul.mubr.msk.bf16.gmra.mxu0 %vm215_vm1, %v4476_v47  ;;  %v2020_v47 = vld [vmem:[#allocation2 + $0x198] sm:$0xff] }
  0xec   : > { %3907 = vmatprep.mubr.msk.bf16.mxu0 %vm215_vm1, %v4478_v56  ;;  %v2021_v56 = vld [vmem:[#allocation2 + $0x1a0] sm:$0xff] }
  0xed   : > { %3870 = vmatmul.mubr.msk.bf16.gmra.mxu1 %vm215_vm1, %v4458_v31  ;;  %v2037_v24 = vpack.c.bf16 %v2021_v56, %v2020_v47  ;;  %v2289_v56 = vld [vmem:[#allocation2 + $0x79] sm:$0xff] }
  0xee   : > { %3873 = vmatprep.mubr.msk.bf16.mxu1 %vm215_vm1, %v4472_v51 }
  0xf3   : > { %v4643_v11 = vpop.f32.mrf.mxu0  ;;  %3908 = vmatmul.mubr.msk.bf16.gmra.mxu0 %vm215_vm1, %v4492_v15  ;;  %v1726_v15 = vld [vmem:[#allocation2 + $0x182] sm:$0xff] }
  0xf4   : > { %3911 = vmatprep.mubr.msk.bf16.mxu0 %vm215_vm1, %v4494_v20  ;;  %v1727_v20 = vld [vmem:[#allocation2 + $0x18a] sm:$0xff] }
  0xf5   : > { %v4649_v12 = vpop.f32.mrf.mxu1  ;;  %3874 = vmatmul.mubr.msk.bf16.gmra.mxu1 %vm215_vm1, %v4474_v55  ;;  %v4653_v14 = vpop.f32.mrf.mxu0  ;;  %v4712_v38 = vpack.c.bf16 %v1727_v20, %v1726_v15  ;;  %v2290_v15 = vld [vmem:[#allocation2 + $0x81] sm:$0xff] }
  0xf6   : > { %3877 = vmatprep.mubr.msk.bf16.mxu1 %vm215_vm1, %v4488_v7 }
  0xf7   : > { %v4657_v16 = vpop.f32.mrf.mxu1  ;;  %v4659_v23 = vpop.f32.mrf.mxu0 }
  0xf9   : > { %v4661_v27 = vpop.f32.mrf.mxu1  ;;  %v4663_v37 = vpop.f32.mrf.mxu0 }
  0xfb   : > { %v4665_v42 = vpop.f32.mrf.mxu1  ;;  %v4667_v45 = vpop.f32.mrf.mxu0  ;;  %3912 = vmatmul.mubr.msk.bf16.gmra.mxu0 %vm215_vm1, %v4508_v44  ;;  %v2315_v44 = vpack.c.bf16 %v2284_v26, %v2283_v25  ;;  %v2291_v25 = vld [vmem:[#allocation2 + $0x91] sm:$0xff]  ;;  %v2292_v26 = vld [vmem:[#allocation2 + $0x99] sm:$0xff] }
  0xfc   : > { %3915 = vmatprep.mubr.msk.bf16.mxu0 %vm215_vm1, %v4510_v49  ;;  %v2319_v34 = vpack.c.bf16 %v2292_v26, %v2291_v25  ;;  %v2296_v25 = vld [vmem:[#allocation2 + $0xc9] sm:$0xff] }
  0xfd   : > { %v4673_v46 = vpop.f32.mrf.mxu1  ;;  %3878 = vmatmul.mubr.msk.bf16.gmra.mxu1 %vm215_vm1, %v4490_v13  ;;  %v4677_v54 = vpop.f32.mrf.mxu0 }
  0xfe   : > { %3881 = vmatprep.mubr.msk.bf16.mxu1 %vm215_vm1, %v4504_v30 }
  0xff   : > { %v4681_v1 = vpop.f32.mrf.mxu1  ;;  %v4683_v3 = vpop.f32.mrf.mxu0 }
 0x101   : > { %v4685_v18 = vpop.f32.mrf.mxu1  ;;  %v4687_v19 = vpop.f32.mrf.mxu0 }
 0x103   : > { %v4689_v32 = vpop.f32.mrf.mxu1  ;;  %v4691_v35 = vpop.f32.mrf.mxu0  ;;  %3916 = vmatmul.mubr.msk.bf16.gmra.mxu0 %vm215_vm1, %v4522_v62  ;;  %v2286_v62 = vld [vmem:[#allocation2 + $0x51] sm:$0xff] }
 0x104   : > { %3919 = vmatprep.mubr.msk.bf16.mxu0 %vm215_vm1, %v1157_v60  ;;  %v2316_v43 = vpack.c.bf16 %v2286_v62, %v2285_v58  ;;  %v2318_v62 = vpack.c.bf16 %v2290_v15, %v2289_v56  ;;  %v2294_v56 = vld [vmem:[#allocation2 + $0xb1] sm:$0xff] }
 0x105   : > { %v4696_v8 = vpop.f32.mrf.mxu1  ;;  %3882 = vmatmul.mubr.msk.bf16.gmra.mxu1 %vm215_vm1, %v4506_v40  ;;  %v4700_v9 = vpop.f32.mrf.mxu0 }
 0x106   : > { %3885 = vmatprep.mubr.msk.bf16.mxu1 %vm215_vm1, %v4520_v61 }
 0x107   : > { %v4704_v21 = vpop.f32.mrf.mxu1  ;;  %v4706_v22 = vpop.f32.mrf.mxu0 }
 0x109   : > { %v4708_v29 = vpop.f32.mrf.mxu1  ;;  %v4710_v36 = vpop.f32.mrf.mxu0 }
 0x10b   : > { %v4714_v49 = vpop.f32.mrf.mxu1  ;;  %v4716_v50 = vpop.f32.mrf.mxu0  ;;  %3920 = vmatmul.mubr.msk.bf16.gmra.mxu0 %vm215_vm1, %v2037_v24 }
 0x10c   : > { %3959 = vmatprep.mubr.msk.bf16.mxu0 %vm215_vm1, %v4388_v41 }
 0x10d   : > { %v4721_v33 = vpop.f32.mrf.mxu1  ;;  %3886 = vmatmul.mubr.msk.bf16.gmra.mxu1 %vm215_vm1, %v4712_v38  ;;  %v4725_v53 = vpop.f32.mrf.mxu0 }
 0x10e   : > { %3925 = vmatprep.mubr.msk.bf16.mxu1 %vm215_vm1, %v2315_v44 }
 0x10f   : > { %v4728_v4 = vpop.f32.mrf.mxu1  ;;  %v4730_v5 = vpop.f32.mrf.mxu0 }
 0x111   : > { %v4732_v39 = vpop.f32.mrf.mxu1  ;;  %v4734_v41 = vpop.f32.mrf.mxu0 }
 0x113   : > { %v4736_v52 = vpop.f32.mrf.mxu1  ;;  %v3757_v60 = vpop.f32.mrf.mxu0  ;;  %3960 = vmatmul.mubr.msk.bf16.vlgmr.msra.gmra.mxu0 %vm215_vm1, %v4422_v59 }
 0x114   : > { %3963 = vmatprep.mubr.msk.bf16.mxu0 %vm215_vm1, %v4426_v63 }
 0x115   : > { %v3723_v0 = vpop.f32.mrf.mxu1  ;;  %3926 = vmatmul.mubr.msk.bf16.vlgmr.msra.gmra.mxu1 %vm215_vm1, %v2316_v43  ;;  %v951_v2 = vpop.f32.mrf.mxu0 }
 0x116   : > { %v699_v47 = vadd.f32 %v3723_v0, %v4643_v11  ;;  %3929 = vmatprep.mubr.msk.bf16.mxu1 %vm215_vm1, %v2317_v48 }
 0x117   : > { %v690_v20 = vpop.f32.mrf.mxu1  ;;  %v3758_v24 = vpop.f32.mrf.mxu0 }
 0x118   : > { %v691_v44 = vadd.f32 %v690_v20, %v4653_v14  ;;  %v4746_v59 = vadd.f32 %v3757_v60, %v699_v47 }
 0x119   : > { %v3724_v58 = vpop.f32.mrf.mxu1  ;;  %v954_v63 = vpop.f32.mrf.mxu0 }
 0x11a   : > { %v702_v6 = vadd.f32 %v3724_v58, %v4659_v23  ;;  %v4749_v43 = vadd.f32 %v951_v2, %v691_v44  ;;  %v2293_v2 = vld [vmem:[#allocation2 + $0xa9] sm:$0xff] }
 0x11b   : > { %v693_v11 = vpop.f32.mrf.mxu1  ;;  %v3761_v48 = vpop.f32.mrf.mxu0  ;;  %3964 = vmatmul.mubr.msk.bf16.gmra.mxu0 %vm215_vm1, %v4440_v10  ;;  %v2320_v58 = vpack.c.bf16 %v2294_v56, %v2293_v2  ;;  %v2300_v56 = vld [vmem:[#allocation2 + $0xf9] sm:$0xff] }
 0x11c   : > { %v694_v0 = vadd.f32 %v693_v11, %v4663_v37  ;;  %3967 = vmatprep.mubr.msk.bf16.mxu0 %vm215_vm1, %v4442_v17  ;;  %v4756_v14 = vadd.f32 %v3758_v24, %v702_v6  ;;  %v2295_v37 = vld [vmem:[#allocation2 + $0xc1] sm:$0xff] }
 0x11d   : > { %v3727_v60 = vpop.f32.mrf.mxu1  ;;  %3930 = vmatmul.mubr.msk.bf16.gmra.mxu1 %vm215_vm1, %v2318_v62  ;;  %v967_v47 = vpop.f32.mrf.mxu0 }
 0x11e   : > { %v715_v23 = vadd.f32 %v3727_v60, %v4667_v45  ;;  %3933 = vmatprep.mubr.msk.bf16.mxu1 %vm215_vm1, %v2319_v34  ;;  %v4761_v15 = vadd.f32 %v954_v63, %v694_v0  ;;  %v2321_v45 = vpack.c.bf16 %v2296_v25, %v2295_v37  ;;  %v2297_v60 = vld [vmem:[#allocation2 + $0xd9] sm:$0xff] }
 0x11f   : > { %v706_v10 = vpop.f32.mrf.mxu1  ;;  %v3762_v20 = vpop.f32.mrf.mxu0 }
 0x120   : > { %v707_v17 = vadd.f32 %v706_v10, %v4677_v54  ;;  %v4764_v24 = vadd.f32 %v3761_v48, %v715_v23 }
 0x121   : > { %v3728_v26 = vpop.f32.mrf.mxu1  ;;  %v970_v44 = vpop.f32.mrf.mxu0 }
 0x122   : > { %v718_v62 = vadd.f32 %v3728_v26, %v4683_v3  ;;  %v4767_v6 = vadd.f32 %v967_v47, %v707_v17  ;;  %v2298_v47 = vld [vmem:[#allocation2 + $0xe1] sm:$0xff] }
 0x123   : > { %v709_v34 = vpop.f32.mrf.mxu1  ;;  %v3765_v11 = vpop.f32.mrf.mxu0  ;;  %3968 = vmatmul.mubr.msk.bf16.gmra.mxu0 %vm215_vm1, %v4456_v28  ;;  %v2322_v25 = vpack.c.bf16 %v2298_v47, %v2297_v60 }
 0x124   : > { %v710_v63 = vadd.f32 %v709_v34, %v4687_v19  ;;  %3971 = vmatprep.mubr.msk.bf16.mxu0 %vm215_vm1, %v4458_v31  ;;  %v4774_v54 = vadd.f32 %v3762_v20, %v718_v62  ;;  %v2299_v19 = vld [vmem:[#allocation2 + $0xf1] sm:$0xff] }
 0x125   : > { %v3731_v48 = vpop.f32.mrf.mxu1  ;;  %3934 = vmatmul.mubr.msk.bf16.gmra.mxu1 %vm215_vm1, %v2320_v58  ;;  %v983_v0 = vpop.f32.mrf.mxu0 }
 0x126   : > { %v731_v3 = vadd.f32 %v3731_v48, %v4691_v35  ;;  %3937 = vmatprep.mubr.msk.bf16.mxu1 %vm215_vm1, %v2321_v45  ;;  %v4779_v23 = vadd.f32 %v970_v44, %v710_v63  ;;  %v2323_v35 = vpack.c.bf16 %v2300_v56, %v2299_v19  ;;  %v2302_v63 = vld [vmem:[#allocation2 + $0x111] sm:$0xff] }
 0x127   : > { %v722_v28 = vpop.f32.mrf.mxu1  ;;  %v3766_v2 = vpop.f32.mrf.mxu0 }
 0x128   : > { %v723_v31 = vadd.f32 %v722_v28, %v4700_v9  ;;  %v4782_v10 = vadd.f32 %v3765_v11, %v731_v3  ;;  %v2301_v11 = vld [vmem:[#allocation2 + $0x109] sm:$0xff] }
 0x129   : > { %v3732_v20 = vpop.f32.mrf.mxu1  ;;  %v986_v37 = vpop.f32.mrf.mxu0  ;;  %v2304_v3 = vld [vmem:[#allocation2 + $0x129] sm:$0xff] }
 0x12a   : > { %v734_v17 = vadd.f32 %v3732_v20, %v4706_v22  ;;  %v4785_v26 = vadd.f32 %v983_v0, %v723_v31 }
 0x12b   : > { %v725_v58 = vpop.f32.mrf.mxu1  ;;  %v3769_v62 = vpop.f32.mrf.mxu0  ;;  %3972 = vmatmul.mubr.msk.bf16.gmra.mxu0 %vm215_vm1, %v4472_v51 }
 0x12c   : > { %v726_v44 = vadd.f32 %v725_v58, %v4710_v36  ;;  %3975 = vmatprep.mubr.msk.bf16.mxu0 %vm215_vm1, %v4474_v55  ;;  %v4792_v9 = vadd.f32 %v3766_v2, %v734_v17  ;;  %v2303_v36 = vld [vmem:[#allocation2 + $0x121] sm:$0xff]  ;;  %v2324_v2 = vpack.c.bf16 %v2302_v63, %v2301_v11 }
 0x12d   : > { %v3735_v45 = vpop.f32.mrf.mxu1  ;;  %3938 = vmatmul.mubr.msk.bf16.gmra.mxu1 %vm215_vm1, %v2322_v25  ;;  %v999_v34 = vpop.f32.mrf.mxu0  ;;  %v2306_v58 = vld [vmem:[#allocation2 + $0x141] sm:$0xff] }
 0x12e   : > { %v747_v22 = vadd.f32 %v3735_v45, %v4716_v50  ;;  %3941 = vmatprep.mubr.msk.bf16.mxu1 %vm215_vm1, %v2323_v35  ;;  %v4797_v48 = vadd.f32 %v986_v37, %v726_v44  ;;  %v2325_v50 = vpack.c.bf16 %v2304_v3, %v2303_v36  ;;  %v2305_v35 = vld [vmem:[#allocation2 + $0x139] sm:$0xff] }
 0x12f   : > { %v738_v51 = vpop.f32.mrf.mxu1  ;;  %v3770_v0 = vpop.f32.mrf.mxu0  ;;  %v2308_v45 = vld [vmem:[#allocation2 + $0x159] sm:$0xff]  ;;  %v2326_v63 = vpack.c.bf16 %v2306_v58, %v2305_v35 }
 0x130   : > { %v739_v55 = vadd.f32 %v738_v51, %v4725_v53  ;;  %v4800_v60 = vadd.f32 %v3769_v62, %v747_v22 }
 0x131   : > { %v3736_v47 = vpop.f32.mrf.mxu1  ;;  %v1002_v28 = vpop.f32.mrf.mxu0 }
 0x132   : > { %v750_v19 = vadd.f32 %v3736_v47, %v4730_v5  ;;  %v4803_v56 = vadd.f32 %v999_v34, %v739_v55 }
 0x133   : > { %v741_v31 = vpop.f32.mrf.mxu1  ;;  %v3773_v20 = vpop.f32.mrf.mxu0  ;;  %3976 = vmatmul.mubr.msk.bf16.gmra.mxu0 %vm215_vm1, %v4488_v7 }
 0x134   : > { %v742_v37 = vadd.f32 %v741_v31, %v4734_v41  ;;  %3979 = vmatprep.mubr.msk.bf16.mxu0 %vm215_vm1, %v4490_v13  ;;  %v4810_v53 = vadd.f32 %v3770_v0, %v750_v19  ;;  %v2307_v41 = vld [vmem:[#allocation2 + $0x151] sm:$0xff] }
 0x135   : > { %v3739_v25 = vpop.f32.mrf.mxu1  ;;  %3942 = vmatmul.mubr.msk.bf16.gmra.mxu1 %vm215_vm1, %v2324_v2  ;;  %v1015_v17 = vpop.f32.mrf.mxu0  ;;  %v2309_v2 = vld [vmem:[#allocation2 + $0x169] sm:$0xff]  ;;  %v2310_v19 = vld [vmem:[#allocation2 + $0x171] sm:$0xff] }
 0x136   : > { %v763_v5 = vadd.f32 %v3739_v25, %v4649_v12  ;;  %3945 = vmatprep.mubr.msk.bf16.mxu1 %vm215_vm1, %v2325_v50  ;;  %v4815_v62 = vadd.f32 %v1002_v28, %v742_v37  ;;  %v2327_v12 = vpack.c.bf16 %v2308_v45, %v2307_v41  ;;  %v2328_v25 = vpack.c.bf16 %v2310_v19, %v2309_v2 }
 0x137   : > { %v754_v7 = vpop.f32.mrf.mxu1  ;;  %v3774_v44 = vpop.f32.mrf.mxu0 }
 0x138   : > { %v755_v13 = vadd.f32 %v754_v7, %v4657_v16  ;;  %v4818_v34 = vadd.f32 %v3773_v20, %v763_v5  ;;  %v2607_v7 = vld [vmem:[#allocation2 + $0x1a2] sm:$0xff] }
 0x139   : > { %v3740_v22 = vpop.f32.mrf.mxu1  ;;  %v1018_v11 = vpop.f32.mrf.mxu0 }
 0x13a   : > { %v766_v51 = vadd.f32 %v3740_v22, %v4661_v27  ;;  %v4821_v0 = vadd.f32 %v1015_v17, %v755_v13  ;;  %v2313_v13 = vld [vmem:[#allocation2 + $0x199] sm:$0xff] }
 0x13b   : > { %v757_v36 = vpop.f32.mrf.mxu1  ;;  %v3777_v3 = vpop.f32.mrf.mxu0  ;;  %3980 = vmatmul.mubr.msk.bf16.gmra.mxu0 %vm215_vm1, %v4504_v30 }
 0x13c   : > { %v758_v55 = vadd.f32 %v757_v36, %v4665_v42  ;;  %3983 = vmatprep.mubr.msk.bf16.mxu0 %vm215_vm1, %v4506_v40  ;;  %v4828_v16 = vadd.f32 %v3774_v44, %v766_v51 }
 0x13d   : > { %v3743_v47 = vpop.f32.mrf.mxu1  ;;  %3946 = vmatmul.mubr.msk.bf16.gmra.mxu1 %vm215_vm1, %v2326_v63  ;;  %v1031_v28 = vpop.f32.mrf.mxu0 }
 0x13e   : > { %v779_v27 = vadd.f32 %v3743_v47, %v4673_v46  ;;  %3949 = vmatprep.mubr.msk.bf16.mxu1 %vm215_vm1, %v2327_v12  ;;  %v4833_v50 = vadd.f32 %v1018_v11, %v758_v55 }
 0x13f   : > { %v770_v30 = vpop.f32.mrf.mxu1  ;;  %v3778_v31 = vpop.f32.mrf.mxu0 }
 0x140   : > { %v771_v42 = vadd.f32 %v770_v30, %v4681_v1  ;;  %v4836_v20 = vadd.f32 %v3777_v3, %v779_v27  ;;  %v2606_v1 = vld [vmem:[#allocation2 + $0x19a] sm:$0xff] }
 0x141   : > { %v3744_v40 = vpop.f32.mrf.mxu1  ;;  %v1034_v37 = vpop.f32.mrf.mxu0 }
 0x142   : > { %v782_v17 = vadd.f32 %v3744_v40, %v4685_v18  ;;  %v4839_v5 = vadd.f32 %v1031_v28, %v771_v42 }
 0x143   : > { %v773_v46 = vpop.f32.mrf.mxu1  ;;  %v3781_v35 = vpop.f32.mrf.mxu0  ;;  %3984 = vmatmul.mubr.msk.bf16.gmra.mxu0 %vm215_vm1, %v4520_v61  ;;  %v2314_v61 = vld [vmem:[#allocation2 + $0x1a1] sm:$0xff] }
 0x144   : > { %v774_v58 = vadd.f32 %v773_v46, %v4689_v32  ;;  %3987 = vmatprep.mubr.msk.bf16.mxu0 %vm215_vm1, %v4712_v38  ;;  %v4846_v44 = vadd.f32 %v3778_v31, %v782_v17  ;;  %v2623_v38 = vpack.c.bf16 %v2607_v7, %v2606_v1  ;;  %v2330_v3 = vpack.c.bf16 %v2314_v61, %v2313_v13 }
 0x145   : > { %v3747_v41 = vpop.f32.mrf.mxu1  ;;  %3950 = vmatmul.mubr.msk.bf16.gmra.mxu1 %vm215_vm1, %v2328_v25  ;;  %v1047_v18 = vpop.f32.mrf.mxu0 }
 0x146   : > { %v795_v45 = vadd.f32 %v3747_v41, %v4696_v8  ;;  %3953 = vmatprep.mubr.msk.bf16.mxu1 %vm215_vm1, %v4600_v57  ;;  %v4852_v22 = vadd.f32 %v1034_v37, %v774_v58 }
 0x147   : > { %v786_v32 = vpop.f32.mrf.mxu1  ;;  %v3782_v11 = vpop.f32.mrf.mxu0 }
 0x148   : > { %v787_v63 = vadd.f32 %v786_v32, %v4704_v21  ;;  %v4855_v51 = vadd.f32 %v3781_v35, %v795_v45 }
 0x149   : > { %v3748_v12 = vpop.f32.mrf.mxu1  ;;  %v1050_v36 = vpop.f32.mrf.mxu0 }
 0x14a   : > { %v798_v55 = vadd.f32 %v3748_v12, %v4708_v29  ;;  %v4858_v8 = vadd.f32 %v1047_v18, %v787_v63 }
 0x14b   : > { %v789_v47 = vpop.f32.mrf.mxu1  ;;  %v3785_v57 = vpop.f32.mrf.mxu0  ;;  %3988 = vmatmul.mubr.msk.bf16.gmra.mxu0 %vm215_vm1, %v2623_v38 }
 0x14c   : > { %v790_v28 = vadd.f32 %v789_v47, %v4714_v49  ;;  %v4862_v27 = vadd.f32 %v3782_v11, %v798_v55 }
 0x14d   : > { %v3751_v2 = vpop.f32.mrf.mxu1  ;;  %3954 = vmatmul.mubr.msk.bf16.gmra.mxu1 %vm215_vm1, %v2330_v3  ;;  %v1063_v21 = vpop.f32.mrf.mxu0 }
 0x14e   : > { %v811_v19 = vadd.f32 %v3751_v2, %v4721_v33  ;;  %v4866_v30 = vadd.f32 %v1050_v36, %v790_v28 }
 0x14f   : > { %v802_v31 = vpop.f32.mrf.mxu1  ;;  %v3786_v29 = vpop.f32.mrf.mxu0 }
 0x150   : > { %v803_v42 = vadd.f32 %v802_v31, %v4728_v4  ;;  %v4869_v40 = vadd.f32 %v3785_v57, %v811_v19 }
 0x151   : > { %v3752_v37 = vpop.f32.mrf.mxu1  ;;  %v1066_v25 = vpop.f32.mrf.mxu0 }
 0x152   : > { %v814_v49 = vadd.f32 %v3752_v37, %v4732_v39  ;;  %v4872_v17 = vadd.f32 %v1063_v21, %v803_v42 }
 0x153   : > { %v805_v46 = vpop.f32.mrf.mxu1  ;;  %v3825_v35 = vpop.f32.mrf.mxu0 }
 0x154   : > { %v806_v58 = vadd.f32 %v805_v46, %v4736_v52  ;;  %v4875_v1 = vadd.f32 %v3786_v29, %v814_v49 }
 0x155   : > { %v3791_v33 = vpop.f32.mrf.mxu1  ;;  %v1537_v7 = vpop.f32.mrf.mxu0 }
 0x156   : > { %v1373_v41 = vadd.f32 %v3791_v33, %v4746_v59  ;;  %v4878_v18 = vadd.f32 %v1066_v25, %v806_v58 }
 0x157   : > { %v1244_v4 = vpop.f32.mrf.mxu1  ;;  %v3826_v45 = vpop.f32.mrf.mxu0 }
 0x158   : > { %v1371_v13 = vadd.f32 %v1244_v4, %v4749_v43  ;;  %v4881_v61 = vadd.f32 %v3825_v35, %v1373_v41 }
 0x159   : > { %v3792_v39 = vpop.f32.mrf.mxu1  ;;  %v1540_v32 = vpop.f32.mrf.mxu0 }
 0x15a   : > { %v1374_v11 = vadd.f32 %v3792_v39, %v4756_v14  ;;  %v4884_v38 = vadd.f32 %v1537_v7, %v1371_v13 }
 0x15b   : > { %v1247_v52 = vpop.f32.mrf.mxu1  ;;  %v3829_v63 = vpop.f32.mrf.mxu0 }
 0x15c   : > { %v1372_v12 = vadd.f32 %v1247_v52, %v4761_v15  ;;  %v4887_v36 = vadd.f32 %v3826_v45, %v1374_v11 }
 0x15d   : > { %v3795_v59 = vpop.f32.mrf.mxu1  ;;  %v1553_v3 = vpop.f32.mrf.mxu0 }
 0x15e   : > { %v1377_v55 = vadd.f32 %v3795_v59, %v4764_v24  ;;  %v4890_v47 = vadd.f32 %v1540_v32, %v1372_v12 }
 0x15f   : > { %v1260_v43 = vpop.f32.mrf.mxu1  ;;  %v3830_v57 = vpop.f32.mrf.mxu0 }
 0x160   : > { %v1375_v28 = vadd.f32 %v1260_v43, %v4767_v6  ;;  %v4893_v2 = vadd.f32 %v3829_v63, %v1377_v55 }
 0x161   : > { %v3796_v14 = vpop.f32.mrf.mxu1  ;;  %v1556_v21 = vpop.f32.mrf.mxu0 }
 0x162   : > { %v1378_v19 = vadd.f32 %v3796_v14, %v4774_v54  ;;  %v4896_v31 = vadd.f32 %v1553_v3, %v1375_v28 }
 0x163   : > { %v1263_v15 = vpop.f32.mrf.mxu1  ;;  %v3833_v29 = vpop.f32.mrf.mxu0 }
 0x164   : > { %v1376_v42 = vadd.f32 %v1263_v15, %v4779_v23  ;;  %v4899_v37 = vadd.f32 %v3830_v57, %v1378_v19 }
 0x165   : > { %v3799_v24 = vpop.f32.mrf.mxu1  ;;  %v1569_v25 = vpop.f32.mrf.mxu0 }
 0x166   : > { %v1381_v49 = vadd.f32 %v3799_v24, %v4782_v10  ;;  %v4902_v46 = vadd.f32 %v1556_v21, %v1376_v42 }
 0x167   : > { %v1276_v6 = vpop.f32.mrf.mxu1  ;;  %v3834_v35 = vpop.f32.mrf.mxu0 }
 0x168   : > { %v1379_v58 = vadd.f32 %v1276_v6, %v4785_v26  ;;  %v4905_v33 = vadd.f32 %v3833_v29, %v1381_v49 }
 0x169   : > { %v3800_v54 = vpop.f32.mrf.mxu1  ;;  %v1572_v7 = vpop.f32.mrf.mxu0 }
 0x16a   : > { %v1382_v41 = vadd.f32 %v3800_v54, %v4792_v9  ;;  %v4908_v4 = vadd.f32 %v1569_v25, %v1379_v58 }
 0x16b   : > { %v1279_v23 = vpop.f32.mrf.mxu1  ;;  %v3837_v45 = vpop.f32.mrf.mxu0 }
 0x16c   : > { %v1380_v13 = vadd.f32 %v1279_v23, %v4797_v48  ;;  %v4911_v39 = vadd.f32 %v3834_v35, %v1382_v41 }
 0x16d   : > { %v3803_v10 = vpop.f32.mrf.mxu1  ;;  %v1585_v32 = vpop.f32.mrf.mxu0 }
 0x16e   : > { %v1385_v11 = vadd.f32 %v3803_v10, %v4800_v60  ;;  %v4914_v52 = vadd.f32 %v1572_v7, %v1380_v13 }
 0x16f   : > { %v1292_v26 = vpop.f32.mrf.mxu1  ;;  %v3838_v63 = vpop.f32.mrf.mxu0 }
 0x170   : > { %v1383_v12 = vadd.f32 %v1292_v26, %v4803_v56  ;;  %v4917_v59 = vadd.f32 %v3837_v45, %v1385_v11 }
 0x171   : > { %v3804_v9 = vpop.f32.mrf.mxu1  ;;  %v1588_v3 = vpop.f32.mrf.mxu0 }
 0x172   : > { %v1386_v55 = vadd.f32 %v3804_v9, %v4810_v53  ;;  %v4920_v43 = vadd.f32 %v1585_v32, %v1383_v12 }
 0x173   : > { %v1295_v48 = vpop.f32.mrf.mxu1  ;;  %v3841_v57 = vpop.f32.mrf.mxu0 }
 0x174   : > { %v1384_v28 = vadd.f32 %v1295_v48, %v4815_v62  ;;  %v4923_v14 = vadd.f32 %v3838_v63, %v1386_v55 }
 0x175   : > { %v3807_v60 = vpop.f32.mrf.mxu1  ;;  %v1601_v21 = vpop.f32.mrf.mxu0 }
 0x176   : > { %v1389_v19 = vadd.f32 %v3807_v60, %v4818_v34  ;;  %v4926_v15 = vadd.f32 %v1588_v3, %v1384_v28 }
 0x177   : > { %v1308_v56 = vpop.f32.mrf.mxu1  ;;  %v3842_v29 = vpop.f32.mrf.mxu0 }
 0x178   : > { %v1387_v42 = vadd.f32 %v1308_v56, %v4821_v0  ;;  %v4929_v24 = vadd.f32 %v3841_v57, %v1389_v19 }
 0x179   : > { %v3808_v53 = vpop.f32.mrf.mxu1  ;;  %v1604_v25 = vpop.f32.mrf.mxu0 }
 0x17a   : > { %v1390_v49 = vadd.f32 %v3808_v53, %v4828_v16  ;;  %v4932_v6 = vadd.f32 %v1601_v21, %v1387_v42 }
 0x17b   : > { %v1311_v62 = vpop.f32.mrf.mxu1  ;;  %v3845_v35 = vpop.f32.mrf.mxu0 }
 0x17c   : > { %v1388_v58 = vadd.f32 %v1311_v62, %v4833_v50  ;;  %v4935_v54 = vadd.f32 %v3842_v29, %v1390_v49 }
 0x17d   : > { %v3811_v34 = vpop.f32.mrf.mxu1  ;;  %v1617_v7 = vpop.f32.mrf.mxu0 }
 0x17e   : > { %v1393_v41 = vadd.f32 %v3811_v34, %v4836_v20  ;;  %v4938_v23 = vadd.f32 %v1604_v25, %v1388_v58 }
 0x17f   : > { %v1324_v0 = vpop.f32.mrf.mxu1  ;;  %v3846_v45 = vpop.f32.mrf.mxu0 }
 0x180   : > { %5410 = vst [vmem:[#allocation6_spill] sm:$0xff] %v4938_v23  ;;  %v1391_v13 = vadd.f32 %v1324_v0, %v4839_v5  ;;  %v4941_v10 = vadd.f32 %v3845_v35, %v1393_v41 }
 0x181   : > { %v3812_v16 = vpop.f32.mrf.mxu1  ;;  %v1620_v32 = vpop.f32.mrf.mxu0 }
 0x182   : > { %5411 = vst [vmem:[#allocation7_spill] sm:$0xff] %v4941_v10  ;;  %v1394_v11 = vadd.f32 %v3812_v16, %v4846_v44  ;;  %v4944_v26 = vadd.f32 %v1617_v7, %v1391_v13 }
 0x183   : > { %v1327_v50 = vpop.f32.mrf.mxu1  ;;  %v3849_v63 = vpop.f32.mrf.mxu0 }
 0x184   : > { %5412 = vst [vmem:[#allocation8_spill] sm:$0xff] %v4944_v26  ;;  %v1392_v12 = vadd.f32 %v1327_v50, %v4852_v22  ;;  %v4947_v9 = vadd.f32 %v3846_v45, %v1394_v11 }
 0x185   : > { %v3815_v20 = vpop.f32.mrf.mxu1  ;;  %v1633_v3 = vpop.f32.mrf.mxu0 }
 0x186   : > { %5413 = vst [vmem:[#allocation9_spill] sm:$0xff] %v4947_v9  ;;  %v1397_v55 = vadd.f32 %v3815_v20, %v4855_v51  ;;  %v4950_v48 = vadd.f32 %v1620_v32, %v1392_v12 }
 0x187   : > { %v1340_v5 = vpop.f32.mrf.mxu1  ;;  %v3850_v57 = vpop.f32.mrf.mxu0 }
 0x188   : > { %5414 = vst [vmem:[#allocation10_spill] sm:$0xff] %v4950_v48  ;;  %v1395_v28 = vadd.f32 %v1340_v5, %v4858_v8  ;;  %v4953_v60 = vadd.f32 %v3849_v63, %v1397_v55 }
 0x189   : > { %v3816_v44 = vpop.f32.mrf.mxu1  ;;  %v1636_v21 = vpop.f32.mrf.mxu0 }
 0x18a   : > { %5415 = vst [vmem:[#allocation11_spill] sm:$0xff] %v4953_v60  ;;  %v1398_v19 = vadd.f32 %v3816_v44, %v4862_v27  ;;  %v4956_v56 = vadd.f32 %v1633_v3, %v1395_v28 }
 0x18b   : > { %v1343_v22 = vpop.f32.mrf.mxu1  ;;  %v3853_v29 = vpop.f32.mrf.mxu0 }
 0x18c   : > { %5416 = vst [vmem:[#allocation12_spill] sm:$0xff] %v4956_v56  ;;  %v1396_v42 = vadd.f32 %v1343_v22, %v4866_v30  ;;  %v4959_v53 = vadd.f32 %v3850_v57, %v1398_v19 }
 0x18d   : > { %v3819_v51 = vpop.f32.mrf.mxu1  ;;  %v1649_v25 = vpop.f32.mrf.mxu0 }
 0x18e   : > { %5417 = vst [vmem:[#allocation13_spill] sm:$0xff] %v4959_v53  ;;  %v1401_v49 = vadd.f32 %v3819_v51, %v4869_v40  ;;  %v4962_v62 = vadd.f32 %v1636_v21, %v1396_v42 }
 0x18f   : > { %v1356_v8 = vpop.f32.mrf.mxu1  ;;  %v3854_v35 = vpop.f32.mrf.mxu0 }
 0x190   : > { %5418 = vst [vmem:[#allocation14_spill] sm:$0xff] %v4962_v62  ;;  %v1399_v58 = vadd.f32 %v1356_v8, %v4872_v17  ;;  %v4965_v34 = vadd.f32 %v3853_v29, %v1401_v49 }
 0x191   : > { %v3820_v27 = vpop.f32.mrf.mxu1  ;;  %v1652_v7 = vpop.f32.mrf.mxu0 }
 0x192   : > { %5419 = vst [vmem:[#allocation15_spill] sm:$0xff] %v4965_v34  ;;  %v1402_v41 = vadd.f32 %v3820_v27, %v4875_v1  ;;  %v4968_v0 = vadd.f32 %v1649_v25, %v1399_v58 }
 0x193   : > { %v1359_v30 = vpop.f32.mrf.mxu1  ;;  %v4970_v45 = vpop.f32.mrf.mxu0 }
 0x194   : > { %5420 = vst [vmem:[#allocation16_spill] sm:$0xff] %v4968_v0  ;;  %v1400_v13 = vadd.f32 %v1359_v30, %v4878_v18  ;;  %v4973_v40 = vadd.f32 %v3854_v35, %v1402_v41 }
 0x195   : > { %v3859_v16 = vpop.f32.mrf.mxu1  ;;  %v4975_v32 = vpop.f32.mrf.mxu0 }
 0x196   : > { %5421 = vst [vmem:[#allocation17_spill] sm:$0xff] %v4973_v40  ;;  %v4977_v11 = vadd.f32 %v1652_v7, %v1400_v13 }
 0x197   : > { %v1830_v17 = vpop.f32.mrf.mxu1  ;;  %v4979_v50 = vpop.f32.mrf.mxu0 }
 0x198   : > { %5422 = vst [vmem:[#allocation18_spill] sm:$0xff] %v4977_v11 }
 0x199   : > { %v3860_v63 = vpop.f32.mrf.mxu1  ;;  %v4981_v12 = vpop.f32.mrf.mxu0 }
 0x19b   : > { %v1833_v1 = vpop.f32.mrf.mxu1  ;;  %v4983_v20 = vpop.f32.mrf.mxu0 }
 0x19d   : > { %v3863_v3 = vpop.f32.mrf.mxu1  ;;  %v4985_v55 = vpop.f32.mrf.mxu0 }
 0x19f   : > { %v1846_v18 = vpop.f32.mrf.mxu1  ;;  %v4987_v5 = vpop.f32.mrf.mxu0 }
 0x1a1   : > { %v3864_v57 = vpop.f32.mrf.mxu1  ;;  %v4989_v28 = vpop.f32.mrf.mxu0 }
 0x1a3   : > { %v1849_v44 = vpop.f32.mrf.mxu1  ;;  %v4991_v21 = vpop.f32.mrf.mxu0 }
 0x1a5   : > { %v3867_v19 = vpop.f32.mrf.mxu1  ;;  %v4993_v22 = vpop.f32.mrf.mxu0 }
 0x1a7   : > { %v1862_v29 = vpop.f32.mrf.mxu1  ;;  %v4995_v42 = vpop.f32.mrf.mxu0 }
 0x1a9   : > { %v3868_v51 = vpop.f32.mrf.mxu1  ;;  %v4997_v25 = vpop.f32.mrf.mxu0 }
 0x1ab   : > { %v1865_v49 = vpop.f32.mrf.mxu1  ;;  %v4999_v8 = vpop.f32.mrf.mxu0 }
 0x1ad   : > { %v3871_v35 = vpop.f32.mrf.mxu1  ;;  %v5001_v58 = vpop.f32.mrf.mxu0 }
 0x1af   : > { %v1878_v27 = vpop.f32.mrf.mxu1  ;;  %v5003_v7 = vpop.f32.mrf.mxu0 }
 0x1b1   : > { %v3872_v41 = vpop.f32.mrf.mxu1  ;;  %v5005_v30 = vpop.f32.mrf.mxu0 }
 0x1b2   : > { %5423 = vst [vmem:[#allocation19_spill] sm:$0xff] %v5005_v30 }
 0x1b3   : > { %v1881_v13 = vpop.f32.mrf.mxu1  ;;  %v5007_v11 = vpop.f32.mrf.mxu0 }
 0x1b4   : > { %5424 = vst [vmem:[#allocation20_spill] sm:$0xff] %v5007_v11 }
 0x1b5   : > { %v3875_v40 = vpop.f32.mrf.mxu1  ;;  %v5009_v0 = vpop.f32.mrf.mxu0 }
 0x1b6   : > { %5425 = vst [vmem:[#allocation21_spill] sm:$0xff] %v5009_v0 }
 0x1b7   : > { %v1894_v34 = vpop.f32.mrf.mxu1  ;;  %v5011_v62 = vpop.f32.mrf.mxu0 }
 0x1b8   : > { %5426 = vst [vmem:[#allocation22_spill] sm:$0xff] %v5011_v62 }
 0x1b9   : > { %v3876_v53 = vpop.f32.mrf.mxu1  ;;  %v5013_v56 = vpop.f32.mrf.mxu0 }
 0x1ba   : > { %5427 = vst [vmem:[#allocation23_spill] sm:$0xff] %v5013_v56 }
 0x1bb   : > { %v5015_v60 = vpop.f32.mrf.mxu1  ;;  %v5017_v48 = vpop.f32.mrf.mxu0 }
 0x1bc   : > { %5428 = vst [vmem:[#allocation24_spill] sm:$0xff] %v5015_v60  ;;  %5429 = vst [vmem:[#allocation25_spill] sm:$0xff] %v5017_v48 }
 0x1bd   : > { %v5019_v9 = vpop.f32.mrf.mxu1  ;;  %v5021_v26 = vpop.f32.mrf.mxu0 }
 0x1be   : > { %5430 = vst [vmem:[#allocation26_spill] sm:$0xff] %v5019_v9  ;;  %5431 = vst [vmem:[#allocation27_spill] sm:$0xff] %v5021_v26 }
 0x1bf   : > { %v5023_v10 = vpop.f32.mrf.mxu1  ;;  %v5025_v11 = vpop.f32.mrf.mxu0 }
 0x1c0   : > { %5432 = vst [vmem:[#allocation28_spill] sm:$0xff] %v5023_v10  ;;  %5433 = vst [vmem:[#allocation29_spill] sm:$0xff] %v5025_v11  ;;  %v1959_v11 = vadd.f32 %v3859_v16, %v4881_v61  ;;  %v1964_v61 = vadd.f32 %v3864_v57, %v4899_v37  ;;  %v5444_v57 = vld [vmem:[#allocation19_spill] sm:$0xff] }
 0x1c1   : > { %v5027_v23 = vpop.f32.mrf.mxu1  ;;  %v5029_v0 = vpop.f32.mrf.mxu0 }
 0x1c2   : > { %5434 = vst [vmem:[#allocation30_spill] sm:$0xff] %v5027_v23  ;;  %5435 = vst [vmem:[#allocation31_spill] sm:$0xff] %v5029_v0 }
 0x1c3   : > { %v5031_v62 = vpop.f32.mrf.mxu1  ;;  %v5033_v30 = vpop.f32.mrf.mxu0 }
 0x1c4   : > { %5436 = vst [vmem:[#allocation32_spill] sm:$0xff] %v5031_v62  ;;  %5437 = vst [vmem:[#allocation33_spill] sm:$0xff] %v5033_v30  ;;  %v1957_v30 = vadd.f32 %v1830_v17, %v4884_v38  ;;  %v2253_v38 = vadd.f32 %v4970_v45, %v1959_v11  ;;  %v1967_v17 = vadd.f32 %v3867_v19, %v4905_v33  ;;  %v5449_v19 = vld [vmem:[#allocation8_spill] sm:$0xff] }
 0x1c5   : > { %v5035_v56 = vpop.f32.mrf.mxu1  ;;  %v5037_v60 = vpop.f32.mrf.mxu0  ;;  %v1972_v33 = vadd.f32 %v3872_v41, %v4923_v14 }
 0x1c6   : > { %5438 = vst [vmem:[#allocation34_spill] sm:$0xff] %v5035_v56  ;;  %5439 = vst [vmem:[#allocation35_spill] sm:$0xff] %v5037_v60  ;;  %v1960_v56 = vadd.f32 %v3860_v63, %v4887_v36  ;;  %v1962_v36 = vadd.f32 %v1849_v44, %v4902_v46  ;;  %v1965_v63 = vadd.f32 %v1862_v29, %v4908_v4  ;;  %v5448_v44 = vld [vmem:[#allocation26_spill] sm:$0xff] }
 0x1c7   : > { %v5039_v48 = vpop.f32.mrf.mxu1  ;;  %v5041_v9 = vpop.f32.mrf.mxu0  ;;  %v1969_v46 = vadd.f32 %v1878_v27, %v4920_v43  ;;  %v1970_v4 = vadd.f32 %v1881_v13, %v4926_v15  ;;  %v5097_v14 = vadd.f32 %v4991_v21, %v1967_v17  ;;  %v5454_v27 = vld [vmem:[#allocation10_spill] sm:$0xff]  ;;  %v5458_v17 = vld [vmem:[#allocation12_spill] sm:$0xff] }
 0x1c8   : > { %5440 = vst [vmem:[#allocation36_spill] sm:$0xff] %v5041_v9  ;;  %v1958_v9 = vadd.f32 %v1833_v1, %v4890_v47  ;;  %v1968_v47 = vadd.f32 %v3868_v51, %v4911_v39  ;;  %v2254_v45 = vadd.f32 %v4979_v50, %v1960_v56  ;;  %v5091_v56 = vadd.f32 %v4987_v5, %v1964_v61  ;;  %v5456_v61 = vld [vmem:[#allocation11_spill] sm:$0xff] }
 0x1c9   : > { %v5043_v26 = vpop.f32.mrf.mxu1  ;;  %v5045_v10 = vpop.f32.mrf.mxu0  ;;  %v5094_v43 = vadd.f32 %v4989_v28, %v1962_v36  ;;  %v5100_v15 = vadd.f32 %v4993_v22, %v1965_v63  ;;  %v5118_v5 = vadd.f32 %v5003_v7, %v1972_v33  ;;  %v5447_v28 = vld [vmem:[#allocation7_spill] sm:$0xff]  ;;  %v5450_v22 = vld [vmem:[#allocation28_spill] sm:$0xff]  ;;  %v1981_v63 = vadd.f32 %v5039_v48, %v5458_v17  ;;  %v5460_v33 = vld [vmem:[#allocation22_spill] sm:$0xff] }
 0x1ca   : > { %5441 = vst [vmem:[#allocation37_spill] sm:$0xff] %v5043_v26  ;;  %5442 = vst [vmem:[#allocation38_spill] sm:$0xff] %v5045_v10  ;;  %v1963_v26 = vadd.f32 %v3863_v3, %v4893_v2  ;;  %v1961_v10 = vadd.f32 %v1846_v18, %v4896_v31  ;;  %v1966_v2 = vadd.f32 %v1865_v49, %v4914_v52 }
 0x1cb   : > { %v5048_v23 = vpop.f32.mrf.mxu1  ;;  %v5050_v0 = vpop.f32.mrf.mxu0  ;;  %v1971_v31 = vadd.f32 %v3871_v35, %v4917_v59  ;;  %v2251_v3 = vadd.f32 %v4975_v32, %v1957_v30  ;;  %v2252_v39 = vadd.f32 %v4981_v12, %v1958_v9  ;;  %v1975_v52 = vadd.f32 %v3875_v40, %v4929_v24  ;;  %v5453_v35 = vld [vmem:[#allocation30_spill] sm:$0xff]  ;;  %v5455_v7 = vld [vmem:[#allocation32_spill] sm:$0xff]  ;;  %v5471_v17 = vld [vmem:[#allocation33_spill] sm:$0xff] }
 0x1cc   : > { %5443 = vst [vmem:[#allocation39_spill] sm:$0xff] %v5048_v23  ;;  %v2257_v18 = vadd.f32 %v4983_v20, %v1963_v26  ;;  %v5088_v32 = vadd.f32 %v4985_v55, %v1961_v10  ;;  %v5103_v24 = vadd.f32 %v4995_v42, %v1968_v47  ;;  %v1973_v26 = vadd.f32 %v1894_v34, %v4932_v6 }
 0x1cd   : > { %v5054_v62 = vpop.f32.mrf.mxu1  ;;  %v5056_v60 = vpop.f32.mrf.mxu0  ;;  %v1976_v10 = vadd.f32 %v3876_v53, %v4935_v54  ;;  %v5108_v50 = vadd.f32 %v4997_v25, %v1966_v2  ;;  %v5111_v12 = vadd.f32 %v4999_v8, %v1971_v31  ;;  %v5115_v55 = vadd.f32 %v5001_v58, %v1969_v46  ;;  %v5445_v54 = vld [vmem:[#allocation6_spill] sm:$0xff]  ;;  %v5446_v53 = vld [vmem:[#allocation24_spill] sm:$0xff]  ;;  %v5452_v8 = vld [vmem:[#allocation9_spill] sm:$0xff] }
 0x1ce   : > { %v5121_v6 = vadd.f32 %v5444_v57, %v1970_v4  ;;  %v1974_v34 = vadd.f32 %v5446_v53, %v5445_v54  ;;  %v1979_v21 = vadd.f32 %v5448_v44, %v5447_v28  ;;  %v1977_v29 = vadd.f32 %v5450_v22, %v5449_v19  ;;  %v5451_v25 = vld [vmem:[#allocation20_spill] sm:$0xff]  ;;  %v5459_v31 = vld [vmem:[#allocation21_spill] sm:$0xff]  ;;  %v5465_v53 = vld [vmem:[#allocation15_spill] sm:$0xff] }
 0x1cf   : > { %v5062_v16 = vpop.f32.mrf.mxu1  ;;  %v5064_v23 = vpop.f32.mrf.mxu0  ;;  %v5130_v49 = vadd.f32 %v5451_v25, %v1975_v52  ;;  %v1980_v58 = vadd.f32 %v5453_v35, %v5452_v8  ;;  %v1978_v41 = vadd.f32 %v5455_v7, %v5454_v27  ;;  %v5146_v46 = vadd.f32 %v5459_v31, %v1973_v26  ;;  %v5466_v26 = vld [vmem:[#allocation23_spill] sm:$0xff] }
 0x1d0   : > { %v5149_v4 = vadd.f32 %v5460_v33, %v1976_v10  ;;  %v1987_v28 = vadd.f32 %v5054_v62, %v5465_v53  ;;  %v5467_v10 = vld [vmem:[#allocation25_spill] sm:$0xff]  ;;  %v5468_v35 = vld [vmem:[#allocation27_spill] sm:$0xff] }
 0x1d1   : > { %v5073_v1 = vpop.f32.mrf.mxu1  ;;  %v5075_v37 = vpop.f32.mrf.mxu0  ;;  %v5462_v52 = vld [vmem:[#allocation37_spill] sm:$0xff]  ;;  %v5161_v25 = vadd.f32 %v5467_v10, %v1979_v21  ;;  %v5166_v27 = vadd.f32 %v5468_v35, %v1977_v29  ;;  %v5470_v62 = vld [vmem:[#allocation31_spill] sm:$0xff] }
 0x1d2   : > { %v5472_v21 = vld [vmem:[#allocation35_spill] sm:$0xff]  ;;  %v5476_v53 = vld [vmem:[#allocation17_spill] sm:$0xff] }
 0x1d3   : > { %v5084_v59 = vpop.f32.mrf.mxu1  ;;  %v3961_v11 = vpop.f32.mrf.mxu0  ;;  %v5178_v31 = vadd.f32 %v5472_v21, %v1981_v63 }
 0x1d5   : > { %v3927_v9 = vpop.f32.mrf.mxu1  ;;  %v2710_v40 = vpop.f32.mrf.mxu0 }
 0x1d6   : > { %v2546_v20 = vadd.f32 %v3927_v9, %v2253_v38  ;;  %v5457_v38 = vld [vmem:[#allocation34_spill] sm:$0xff] }
 0x1d7   : > { %v2417_v42 = vpop.f32.mrf.mxu1  ;;  %v3962_v51 = vpop.f32.mrf.mxu0  ;;  %v1983_v36 = vadd.f32 %v5457_v38, %v5456_v61  ;;  %v5463_v9 = vld [vmem:[#allocation14_spill] sm:$0xff] }
 0x1d8   : > { %v2839_v30 = vadd.f32 %v3961_v11, %v2546_v20  ;;  %v2544_v13 = vadd.f32 %v2417_v42, %v2251_v3  ;;  %v5461_v3 = vld [vmem:[#allocation13_spill] sm:$0xff]  ;;  %v5464_v20 = vld [vmem:[#allocation39_spill] sm:$0xff]  ;;  %v5158_v42 = vadd.f32 %v5466_v26, %v1974_v34 }
 0x1d9   : > { %v3928_v47 = vpop.f32.mrf.mxu1  ;;  %v2713_v2 = vpop.f32.mrf.mxu0  ;;  %v1984_v11 = vadd.f32 %v5462_v52, %v5461_v3  ;;  %v1982_v48 = vadd.f32 %v5464_v20, %v5463_v9 }
 0x1da   : > { %v3502_v57 = vpack.c.bf16 %v2839_v30, %v2839_v30  ;;  %v2837_v54 = vadd.f32 %v2710_v40, %v2544_v13  ;;  %v2547_v44 = vadd.f32 %v3928_v47, %v2254_v45  ;;  %v5469_v40 = vld [vmem:[#allocation29_spill] sm:$0xff]  ;;  %v5172_v45 = vadd.f32 %v5470_v62, %v1978_v41  ;;  %v5474_v41 = vld [vmem:[#allocation38_spill] sm:$0xff] }
 0x1db   : > { %v2420_v19 = vpop.f32.mrf.mxu1  ;;  %v3965_v22 = vpop.f32.mrf.mxu0  ;;  %v5169_v7 = vadd.f32 %v5469_v40, %v1980_v58  ;;  %v5175_v47 = vadd.f32 %v5471_v17, %v1983_v36  ;;  %v5473_v58 = vld [vmem:[#allocation36_spill] sm:$0xff]  ;;  %v5186_v52 = vadd.f32 %v5474_v41, %v1982_v48 }
 0x1dc   : > { %3000 = vst.msk [vmem:[%s5143_s5 + $0x8] sm:$0xf] %vm2997_vm4, %v3502_v57  ;;  %v3500_v8 = vpack.c.bf16 %v2837_v54, %v2837_v54  ;;  %v2840_v13 = vadd.f32 %v3962_v51, %v2547_v44  ;;  %v2545_v61 = vadd.f32 %v2420_v19, %v2252_v39  ;;  %v3099_v29 = vmul.f32 %v2837_v54, %v2837_v54  ;;  %v5475_v39 = vld [vmem:[#allocation16_spill] sm:$0xff] }
 0x1dd   : > { %v3931_v38 = vpop.f32.mrf.mxu1  ;;  %v2726_v34 = vpop.f32.mrf.mxu0  ;;  %v5183_v3 = vadd.f32 %v5473_v58, %v1984_v11  ;;  %v5190_v51 = vadd.f32 %v5062_v16, %v5475_v39  ;;  %v5193_v57 = vadd.f32 %v5050_v0, %v1987_v28  ;;  %v3101_v11 = vmul.f32 %v2839_v30, %v2839_v30 }
 0x1de   : > { %2998 = vst.msk [vmem:[%s5143_s5] sm:$0xf] %vm2997_vm4, %v3500_v8  ;;  %v2550_v33 = vadd.f32 %v3931_v38, %v2257_v18  ;;  %v3503_v36 = vpack.c.bf16 %v2840_v13, %v2840_v13  ;;  %v2838_v9 = vadd.f32 %v2713_v2, %v2545_v61  ;;  %v5197_v18 = vadd.f32 %v5073_v1, %v5476_v53 }
 0x1df   : > { %v2433_v20 = vpop.f32.mrf.mxu1  ;;  %v3966_v63 = vpop.f32.mrf.mxu0  ;;  %v3030_v19 = vsel %vm215_vm1, %v2837_v54, 0.0  ;;  %v3033_v28 = vsel %vm215_vm1, %v2839_v30, 0.0  ;;  %v3131_v1 = vsel %vm215_vm1, %v3099_v29, 0.0  ;;  %v3134_v38 = vsel %vm215_vm1, %v3101_v11, 0.0 }
 0x1e0   : > { %v2843_v44 = vadd.f32 %v3965_v22, %v2550_v33  ;;  %v2548_v48 = vadd.f32 %v2433_v20, %v5088_v32  ;;  %3001 = vst.msk [vmem:[%s5143_s5 + $0xc] sm:$0xf] %vm2997_vm4, %v3503_v36  ;;  %v3501_v16 = vpack.c.bf16 %v2838_v9, %v2838_v9  ;;  %v3031_v2 = vsel %vm215_vm1, %v2838_v9, 0.0 }
 0x1e1   : > { %v3100_v26 = vmul.f32 %v2838_v9, %v2838_v9  ;;  %v3932_v10 = vpop.f32.mrf.mxu1  ;;  %v2729_v0 = vpop.f32.mrf.mxu0  ;;  %v3032_v8 = vadd.f32 %v3031_v2, %v3030_v19  ;;  %v3102_v22 = vmul.f32 %v2840_v13, %v2840_v13  ;;  %v3035_v29 = vsel %vm215_vm1, %v2840_v13, 0.0 }
 0x1e2   : > { %v3506_v35 = vpack.c.bf16 %v2843_v44, %v2843_v44  ;;  %2999 = vst.msk [vmem:[%s5143_s5 + $0x4] sm:$0xf] %vm2997_vm4, %v3501_v16  ;;  %v2841_v54 = vadd.f32 %v2726_v34, %v2548_v48  ;;  %v2551_v40 = vadd.f32 %v3932_v10, %v5091_v56  ;;  %v3105_v11 = vmul.f32 %v2843_v44, %v2843_v44 }
 0x1e3   : > { %v3132_v32 = vsel %vm215_vm1, %v3100_v26, 0.0  ;;  %v2436_v62 = vpop.f32.mrf.mxu1  ;;  %v3969_v61 = vpop.f32.mrf.mxu0  ;;  %v3034_v17 = vadd.f32 %v3033_v28, %v3032_v8  ;;  %v3136_v53 = vsel %vm215_vm1, %v3102_v22, 0.0 }
 0x1e4   : > { %v3133_v21 = vadd.f32 %v3132_v32, %v3131_v1  ;;  %3004 = vst.msk [vmem:[%s5143_s5 + $0x18] sm:$0xf] %vm2997_vm4, %v3506_v35  ;;  %v2549_v30 = vadd.f32 %v2436_v62, %v5094_v43  ;;  %v3504_v33 = vpack.c.bf16 %v2841_v54, %v2841_v54  ;;  %v3103_v58 = vmul.f32 %v2841_v54, %v2841_v54 }
 0x1e5   : > { %v2844_v41 = vadd.f32 %v3966_v63, %v2551_v40  ;;  %v3935_v39 = vpop.f32.mrf.mxu1  ;;  %v2742_v34 = vpop.f32.mrf.mxu0  ;;  %v3036_v56 = vadd.f32 %v3035_v29, %v3034_v17  ;;  %v3037_v43 = vsel %vm215_vm1, %v2841_v54, 0.0  ;;  %v5230_v54 = vadd.f32 %v5056_v60, %v5190_v51 }
 0x1e6   : > { %v3135_v36 = vadd.f32 %v3134_v38, %v3133_v21  ;;  %v2842_v9 = vadd.f32 %v2729_v0, %v2549_v30  ;;  %v2554_v20 = vadd.f32 %v3935_v39, %v5097_v14  ;;  %3002 = vst.msk [vmem:[%s5143_s5 + $0x10] sm:$0xf] %vm2997_vm4, %v3504_v33  ;;  %v3138_v10 = vsel %vm215_vm1, %v3103_v58, 0.0  ;;  %v5477_v58 = vld [vmem:[#allocation18_spill] sm:$0xff] }
 0x1e7   : > { %v3507_v13 = vpack.c.bf16 %v2844_v41, %v2844_v41  ;;  %v2449_v48 = vpop.f32.mrf.mxu1  ;;  %v3970_v19 = vpop.f32.mrf.mxu0  ;;  %v3038_v63 = vadd.f32 %v3037_v43, %v3036_v56  ;;  %v3041_v40 = vsel %vm215_vm1, %v2843_v44, 0.0  ;;  %v3106_v62 = vmul.f32 %v2844_v41, %v2844_v41 }
 0x1e8   : > { %v3137_v16 = vadd.f32 %v3136_v53, %v3135_v36  ;;  %v3505_v2 = vpack.c.bf16 %v2842_v9, %v2842_v9  ;;  %v3039_v26 = vsel %vm215_vm1, %v2842_v9, 0.0  ;;  %v3104_v14 = vmul.f32 %v2842_v9, %v2842_v9 }
 0x1e9   : > { %3005 = vst.msk [vmem:[%s5143_s5 + $0x1c] sm:$0xf] %vm2997_vm4, %v3507_v13  ;;  %v2847_v0 = vadd.f32 %v3969_v61, %v2554_v20  ;;  %v2552_v28 = vadd.f32 %v2449_v48, %v5100_v15  ;;  %v3936_v1 = vpop.f32.mrf.mxu1  ;;  %v2745_v8 = vpop.f32.mrf.mxu0  ;;  %v3040_v22 = vadd.f32 %v3039_v26, %v3038_v63  ;;  %v1986_v39 = vadd.f32 %v5084_v59, %v5477_v58 }
 0x1ea   : > { %v3139_v35 = vadd.f32 %v3138_v10, %v3137_v16  ;;  %3003 = vst.msk [vmem:[%s5143_s5 + $0x14] sm:$0xf] %vm2997_vm4, %v3505_v2  ;;  %v2555_v32 = vadd.f32 %v3936_v1, %v5103_v24  ;;  %v3140_v61 = vsel %vm215_vm1, %v3104_v14, 0.0  ;;  %v3142_v24 = vsel %vm215_vm1, %v3105_v11, 0.0 }
 0x1eb   : > { %v3510_v38 = vpack.c.bf16 %v2847_v0, %v2847_v0  ;;  %v2452_v15 = vpop.f32.mrf.mxu1  ;;  %v3973_v17 = vpop.f32.mrf.mxu0  ;;  %v3042_v21 = vadd.f32 %v3041_v40, %v3040_v22  ;;  %v2845_v29 = vadd.f32 %v2742_v34, %v2552_v28  ;;  %v3043_v60 = vsel %vm215_vm1, %v2844_v41, 0.0 }
 0x1ec   : > { %v3141_v30 = vadd.f32 %v3140_v61, %v3139_v35  ;;  %v2848_v33 = vadd.f32 %v3970_v19, %v2555_v32  ;;  %v2553_v51 = vadd.f32 %v2452_v15, %v5108_v50  ;;  %v5243_v34 = vadd.f32 %v5064_v23, %v5197_v18 }
 0x1ed   : > { %3008 = vst.msk [vmem:[%s5143_s5 + $0x28] sm:$0xf] %vm2997_vm4, %v3510_v38  ;;  %v3939_v44 = vpop.f32.mrf.mxu1  ;;  %v2758_v36 = vpop.f32.mrf.mxu0  ;;  %v3508_v9 = vpack.c.bf16 %v2845_v29, %v2845_v29  ;;  %v3044_v20 = vadd.f32 %v3043_v60, %v3042_v21  ;;  %v3144_v59 = vsel %vm215_vm1, %v3106_v62, 0.0  ;;  %v3045_v53 = vsel %vm215_vm1, %v2845_v29, 0.0 }
 0x1ee   : > { %v3143_v56 = vadd.f32 %v3142_v24, %v3141_v30  ;;  %v3107_v11 = vmul.f32 %v2845_v29, %v2845_v29  ;;  %v3511_v41 = vpack.c.bf16 %v2848_v33, %v2848_v33  ;;  %v2846_v19 = vadd.f32 %v2745_v8, %v2553_v51 }
 0x1ef   : > { %v2465_v43 = vpop.f32.mrf.mxu1  ;;  %v3974_v13 = vpop.f32.mrf.mxu0  ;;  %3006 = vst.msk [vmem:[%s5143_s5 + $0x20] sm:$0xf] %vm2997_vm4, %v3508_v9  ;;  %v3046_v50 = vadd.f32 %v3045_v53, %v3044_v20  ;;  %v2558_v63 = vadd.f32 %v3939_v44, %v5111_v12  ;;  %v3109_v16 = vmul.f32 %v2847_v0, %v2847_v0  ;;  %v3110_v23 = vmul.f32 %v2848_v33, %v2848_v33 }
 0x1f0   : > { %v3145_v48 = vadd.f32 %v3144_v59, %v3143_v56  ;;  %v3146_v2 = vsel %vm215_vm1, %v3107_v11, 0.0  ;;  %3009 = vst.msk [vmem:[%s5143_s5 + $0x2c] sm:$0xf] %vm2997_vm4, %v3511_v41  ;;  %v2556_v18 = vadd.f32 %v2465_v43, %v5115_v55  ;;  %v3509_v28 = vpack.c.bf16 %v2846_v19, %v2846_v19 }
 0x1f1   : > { %v3940_v26 = vpop.f32.mrf.mxu1  ;;  %v2761_v10 = vpop.f32.mrf.mxu0  ;;  %v3047_v1 = vsel %vm215_vm1, %v2846_v19, 0.0  ;;  %v3108_v35 = vmul.f32 %v2846_v19, %v2846_v19  ;;  %v2851_v8 = vadd.f32 %v3973_v17, %v2558_v63  ;;  %v3049_v61 = vsel %vm215_vm1, %v2847_v0, 0.0 }
 0x1f2   : > { %v3147_v14 = vadd.f32 %v3146_v2, %v3145_v48  ;;  %v3048_v22 = vadd.f32 %v3047_v1, %v3046_v50  ;;  %v2849_v32 = vadd.f32 %v2758_v36, %v2556_v18  ;;  %v2559_v12 = vadd.f32 %v3940_v26, %v5118_v5  ;;  %3007 = vst.msk [vmem:[%s5143_s5 + $0x24] sm:$0xf] %vm2997_vm4, %v3509_v28 }
 0x1f3   : > { %v2468_v40 = vpop.f32.mrf.mxu1  ;;  %v3977_v62 = vpop.f32.mrf.mxu0  ;;  %v3148_v55 = vsel %vm215_vm1, %v3108_v35, 0.0  ;;  %v5262_v15 = vadd.f32 %v5075_v37, %v1986_v39  ;;  %v3150_v21 = vsel %vm215_vm1, %v3109_v16, 0.0  ;;  %v3514_v5 = vpack.c.bf16 %v2851_v8, %v2851_v8 }
 0x1f4   : > { %v2557_v38 = vadd.f32 %v2468_v40, %v5121_v6  ;;  %v3050_v17 = vadd.f32 %v3049_v61, %v3048_v22  ;;  %v3149_v30 = vadd.f32 %v3148_v55, %v3147_v14  ;;  %v3051_v0 = vsel %vm215_vm1, %v2848_v33, 0.0 }
 0x1f5   : > { %v3943_v29 = vpop.f32.mrf.mxu1  ;;  %v2774_v58 = vpop.f32.mrf.mxu0  ;;  %v3152_v24 = vsel %vm215_vm1, %v3110_v23, 0.0  ;;  %v3512_v60 = vpack.c.bf16 %v2849_v32, %v2849_v32  ;;  %v3111_v51 = vmul.f32 %v2849_v32, %v2849_v32  ;;  %3012 = vst.msk [vmem:[%s5143_s5 + $0x38] sm:$0xf] %vm2997_vm4, %v3514_v5  ;;  %v2852_v37 = vadd.f32 %v3974_v13, %v2559_v12 }
 0x1f6   : > { %v3151_v44 = vadd.f32 %v3150_v21, %v3149_v30  ;;  %v3052_v6 = vadd.f32 %v3051_v0, %v3050_v17  ;;  %v2850_v39 = vadd.f32 %v2761_v10, %v2557_v38  ;;  %v3113_v9 = vmul.f32 %v2851_v8, %v2851_v8 }
 0x1f7   : > { %v2481_v36 = vpop.f32.mrf.mxu1  ;;  %v3978_v56 = vpop.f32.mrf.mxu0  ;;  %3010 = vst.msk [vmem:[%s5143_s5 + $0x30] sm:$0xf] %vm2997_vm4, %v3512_v60  ;;  %v3053_v20 = vsel %vm215_vm1, %v2849_v32, 0.0  ;;  %v2562_v33 = vadd.f32 %v3943_v29, %v5130_v49  ;;  %v3154_v41 = vsel %vm215_vm1, %v3111_v51, 0.0  ;;  %v3515_v43 = vpack.c.bf16 %v2852_v37, %v2852_v37 }
 0x1f8   : > { %v2560_v59 = vadd.f32 %v2481_v36, %v5146_v46  ;;  %v3054_v53 = vadd.f32 %v3053_v20, %v3052_v6  ;;  %v3153_v11 = vadd.f32 %v3152_v24, %v3151_v44  ;;  %v3114_v48 = vmul.f32 %v2852_v37, %v2852_v37 }
 0x1f9   : > { %v3944_v13 = vpop.f32.mrf.mxu1  ;;  %v2777_v50 = vpop.f32.mrf.mxu0  ;;  %v3513_v19 = vpack.c.bf16 %v2850_v39, %v2850_v39  ;;  %v3055_v63 = vsel %vm215_vm1, %v2850_v39, 0.0  ;;  %v3112_v16 = vmul.f32 %v2850_v39, %v2850_v39  ;;  %3013 = vst.msk [vmem:[%s5143_s5 + $0x3c] sm:$0xf] %vm2997_vm4, %v3515_v43  ;;  %v2855_v49 = vadd.f32 %v3977_v62, %v2562_v33 }
 0x1fa   : > { %v3155_v2 = vadd.f32 %v3154_v41, %v3153_v11  ;;  %v3056_v23 = vadd.f32 %v3055_v63, %v3054_v53  ;;  %v2853_v18 = vadd.f32 %v2774_v58, %v2560_v59  ;;  %v3057_v10 = vsel %vm215_vm1, %v2851_v8, 0.0 }
 0x1fb   : > { %v2484_v46 = vpop.f32.mrf.mxu1  ;;  %v3981_v26 = vpop.f32.mrf.mxu0  ;;  %3011 = vst.msk [vmem:[%s5143_s5 + $0x34] sm:$0xf] %vm2997_vm4, %v3513_v19  ;;  %v3156_v14 = vsel %vm215_vm1, %v3112_v16, 0.0  ;;  %v2563_v28 = vadd.f32 %v3944_v13, %v5149_v4  ;;  %v3158_v35 = vsel %vm215_vm1, %v3113_v9, 0.0  ;;  %v3518_v12 = vpack.c.bf16 %v2855_v49, %v2855_v49 }
 0x1fc   : > { %v2561_v1 = vadd.f32 %v2484_v46, %v5158_v42  ;;  %v3058_v22 = vadd.f32 %v3057_v10, %v3056_v23  ;;  %v3157_v32 = vadd.f32 %v3156_v14, %v3155_v2  ;;  %v3059_v61 = vsel %vm215_vm1, %v2852_v37, 0.0 }
 0x1fd   : > { %v3947_v40 = vpop.f32.mrf.mxu1  ;;  %v2790_v62 = vpop.f32.mrf.mxu0  ;;  %v3160_v8 = vsel %vm215_vm1, %v3114_v48, 0.0  ;;  %v3516_v55 = vpack.c.bf16 %v2853_v18, %v2853_v18  ;;  %v3115_v38 = vmul.f32 %v2853_v18, %v2853_v18  ;;  %3016 = vst.msk [vmem:[%s5143_s5 + $0x48] sm:$0xf] %vm2997_vm4, %v3518_v12  ;;  %v2856_v17 = vadd.f32 %v3978_v56, %v2563_v28 }
 0x1fe   : > { %v3159_v21 = vadd.f32 %v3158_v35, %v3157_v32  ;;  %v3060_v4 = vadd.f32 %v3059_v61, %v3058_v22  ;;  %v2854_v42 = vadd.f32 %v2777_v50, %v2561_v1  ;;  %v3117_v29 = vmul.f32 %v2855_v49, %v2855_v49 }
 0x1ff   : > { %v2497_v30 = vpop.f32.mrf.mxu1  ;;  %v3982_v5 = vpop.f32.mrf.mxu0  ;;  %3014 = vst.msk [vmem:[%s5143_s5 + $0x40] sm:$0xf] %vm2997_vm4, %v3516_v55  ;;  %v3061_v58 = vsel %vm215_vm1, %v2853_v18, 0.0  ;;  %v2566_v0 = vadd.f32 %v3947_v40, %v5161_v25  ;;  %v3162_v44 = vsel %vm215_vm1, %v3115_v38, 0.0  ;;  %v3519_v6 = vpack.c.bf16 %v2856_v17, %v2856_v17 }
 0x200   : > { %v2564_v24 = vadd.f32 %v2497_v30, %v5166_v27  ;;  %v3062_v60 = vadd.f32 %v3061_v58, %v3060_v4  ;;  %v3161_v51 = vadd.f32 %v3160_v8, %v3159_v21  ;;  %v3118_v36 = vmul.f32 %v2856_v17, %v2856_v17 }
 0x201   : > { %v3948_v37 = vpop.f32.mrf.mxu1  ;;  %v2793_v39 = vpop.f32.mrf.mxu0  ;;  %v3517_v56 = vpack.c.bf16 %v2854_v42, %v2854_v42  ;;  %v3063_v9 = vsel %vm215_vm1, %v2854_v42, 0.0  ;;  %v3116_v20 = vmul.f32 %v2854_v42, %v2854_v42  ;;  %3017 = vst.msk [vmem:[%s5143_s5 + $0x4c] sm:$0xf] %vm2997_vm4, %v3519_v6  ;;  %v2859_v25 = vadd.f32 %v3981_v26, %v2566_v0 }
 0x202   : > { %v3163_v33 = vadd.f32 %v3162_v44, %v3161_v51  ;;  %v3064_v59 = vadd.f32 %v3063_v9, %v3062_v60  ;;  %v2857_v53 = vadd.f32 %v2790_v62, %v2564_v24  ;;  %v3065_v41 = vsel %vm215_vm1, %v2855_v49, 0.0 }
 0x203   : > { %v2500_v27 = vpop.f32.mrf.mxu1  ;;  %v3985_v11 = vpop.f32.mrf.mxu0  ;;  %3015 = vst.msk [vmem:[%s5143_s5 + $0x44] sm:$0xf] %vm2997_vm4, %v3517_v56  ;;  %v3164_v43 = vsel %vm215_vm1, %v3116_v20, 0.0  ;;  %v2567_v13 = vadd.f32 %v3948_v37, %v5169_v7  ;;  %v3166_v48 = vsel %vm215_vm1, %v3117_v29, 0.0  ;;  %v3522_v16 = vpack.c.bf16 %v2859_v25, %v2859_v25 }
 0x204   : > { %v2565_v50 = vadd.f32 %v2500_v27, %v5172_v45  ;;  %v3066_v19 = vadd.f32 %v3065_v41, %v3064_v59  ;;  %v3165_v63 = vadd.f32 %v3164_v43, %v3163_v33  ;;  %v3067_v18 = vsel %vm215_vm1, %v2856_v17, 0.0 }
 0x205   : > { %v3951_v2 = vpop.f32.mrf.mxu1  ;;  %v2806_v23 = vpop.f32.mrf.mxu0  ;;  %v3168_v49 = vsel %vm215_vm1, %v3118_v36, 0.0  ;;  %v3520_v46 = vpack.c.bf16 %v2857_v53, %v2857_v53  ;;  %v3119_v26 = vmul.f32 %v2857_v53, %v2857_v53  ;;  %3020 = vst.msk [vmem:[%s5143_s5 + $0x58] sm:$0xf] %vm2997_vm4, %v3522_v16  ;;  %v2860_v14 = vadd.f32 %v3982_v5, %v2567_v13 }
 0x206   : > { %v3167_v10 = vadd.f32 %v3166_v48, %v3165_v63  ;;  %v3068_v7 = vadd.f32 %v3067_v18, %v3066_v19  ;;  %v2858_v45 = vadd.f32 %v2793_v39, %v2565_v50  ;;  %v3121_v35 = vmul.f32 %v2859_v25, %v2859_v25 }
 0x207   : > { %v2513_v28 = vpop.f32.mrf.mxu1  ;;  %v3986_v1 = vpop.f32.mrf.mxu0  ;;  %3018 = vst.msk [vmem:[%s5143_s5 + $0x50] sm:$0xf] %vm2997_vm4, %v3520_v46  ;;  %v3069_v22 = vsel %vm215_vm1, %v2857_v53, 0.0  ;;  %v2570_v32 = vadd.f32 %v3951_v2, %v5175_v47  ;;  %v3170_v61 = vsel %vm215_vm1, %v3119_v26, 0.0  ;;  %v3523_v8 = vpack.c.bf16 %v2860_v14, %v2860_v14 }
 0x208   : > { %v2568_v12 = vadd.f32 %v2513_v28, %v5178_v31  ;;  %v3070_v40 = vadd.f32 %v3069_v22, %v3068_v7  ;;  %v3169_v62 = vadd.f32 %v3168_v49, %v3167_v10  ;;  %v3122_v21 = vmul.f32 %v2860_v14, %v2860_v14 }
 0x209   : > { %v3952_v55 = vpop.f32.mrf.mxu1  ;;  %v2809_v38 = vpop.f32.mrf.mxu0  ;;  %v3521_v4 = vpack.c.bf16 %v2858_v45, %v2858_v45  ;;  %v3071_v17 = vsel %vm215_vm1, %v2858_v45, 0.0  ;;  %v3120_v42 = vmul.f32 %v2858_v45, %v2858_v45  ;;  %3021 = vst.msk [vmem:[%s5143_s5 + $0x5c] sm:$0xf] %vm2997_vm4, %v3523_v8  ;;  %v2863_v47 = vadd.f32 %v3985_v11, %v2570_v32 }
 0x20a   : > { %v3171_v30 = vadd.f32 %v3170_v61, %v3169_v62  ;;  %v3072_v5 = vadd.f32 %v3071_v17, %v3070_v40  ;;  %v2861_v29 = vadd.f32 %v2806_v23, %v2568_v12  ;;  %v3073_v0 = vsel %vm215_vm1, %v2859_v25, 0.0 }
 0x20b   : > { %v2516_v31 = vpop.f32.mrf.mxu1  ;;  %v3989_v58 = vpop.f32.mrf.mxu0  ;;  %3019 = vst.msk [vmem:[%s5143_s5 + $0x54] sm:$0xf] %vm2997_vm4, %v3521_v4  ;;  %v3172_v24 = vsel %vm215_vm1, %v3120_v42, 0.0  ;;  %v2571_v60 = vadd.f32 %v3952_v55, %v5183_v3  ;;  %v3174_v44 = vsel %vm215_vm1, %v3121_v35, 0.0  ;;  %v3526_v39 = vpack.c.bf16 %v2863_v47, %v2863_v47 }
 0x20c   : > { %v2569_v51 = vadd.f32 %v2516_v31, %v5186_v52  ;;  %v3074_v6 = vadd.f32 %v3073_v0, %v3072_v5  ;;  %v3173_v37 = vadd.f32 %v3172_v24, %v3171_v30  ;;  %v3075_v56 = vsel %vm215_vm1, %v2860_v14, 0.0 }
 0x20d   : > { %v3955_v36 = vpop.f32.mrf.mxu1  ;;  %v3176_v9 = vsel %vm215_vm1, %v3122_v21, 0.0  ;;  %v3524_v20 = vpack.c.bf16 %v2861_v29, %v2861_v29  ;;  %v3123_v33 = vmul.f32 %v2861_v29, %v2861_v29  ;;  %v2822_v59 = vpop.f32.mrf.mxu0  ;;  %3024 = vst.msk [vmem:[%s5143_s5 + $0x68] sm:$0xf] %vm2997_vm4, %v3526_v39  ;;  %v2864_v53 = vadd.f32 %v3986_v1, %v2571_v60 }
 0x20e   : > { %v3175_v25 = vadd.f32 %v3174_v44, %v3173_v37  ;;  %v3076_v3 = vadd.f32 %v3075_v56, %v3074_v6  ;;  %v2862_v52 = vadd.f32 %v2809_v38, %v2569_v51  ;;  %v3081_v11 = vsel %vm215_vm1, %v2863_v47, 0.0 }
 0x20f   : > { %v2529_v27 = vpop.f32.mrf.mxu1  ;;  %3022 = vst.msk [vmem:[%s5143_s5 + $0x60] sm:$0xf] %vm2997_vm4, %v3524_v20  ;;  %v3077_v41 = vsel %vm215_vm1, %v2861_v29, 0.0  ;;  %v2574_v43 = vadd.f32 %v3955_v36, %v5193_v57  ;;  %v3125_v50 = vmul.f32 %v2863_v47, %v2863_v47  ;;  %v3527_v63 = vpack.c.bf16 %v2864_v53, %v2864_v53  ;;  %v3990_v46 = vpop.f32.mrf.mxu0 }
 0x210   : > { %v2572_v13 = vadd.f32 %v2529_v27, %v5230_v54  ;;  %v3078_v48 = vadd.f32 %v3077_v41, %v3076_v3  ;;  %v3177_v19 = vadd.f32 %v3176_v9, %v3175_v25  ;;  %v3178_v2 = vsel %vm215_vm1, %v3123_v33, 0.0 }
 0x211   : > { %v3956_v16 = vpop.f32.mrf.mxu1  ;;  %v3525_v23 = vpack.c.bf16 %v2862_v52, %v2862_v52  ;;  %v3079_v18 = vsel %vm215_vm1, %v2862_v52, 0.0  ;;  %v3124_v49 = vmul.f32 %v2862_v52, %v2862_v52  ;;  %3025 = vst.msk [vmem:[%s5143_s5 + $0x6c] sm:$0xf] %vm2997_vm4, %v3527_v63  ;;  %v2867_v57 = vadd.f32 %v3989_v58, %v2574_v43  ;;  %v2825_v8 = vpop.f32.mrf.mxu0 }
 0x212   : > { %v3179_v26 = vadd.f32 %v3178_v2, %v3177_v19  ;;  %v3080_v10 = vadd.f32 %v3079_v18, %v3078_v48  ;;  %v2865_v7 = vadd.f32 %v2822_v59, %v2572_v13  ;;  %v3126_v14 = vmul.f32 %v2864_v53, %v2864_v53 }
 0x213   : > { %v2532_v54 = vpop.f32.mrf.mxu1  ;;  %3023 = vst.msk [vmem:[%s5143_s5 + $0x64] sm:$0xf] %vm2997_vm4, %v3525_v23  ;;  %v3180_v45 = vsel %vm215_vm1, %v3124_v49, 0.0  ;;  %v2575_v28 = vadd.f32 %v3956_v16, %v5243_v34  ;;  %v3530_v32 = vpack.c.bf16 %v2867_v57, %v2867_v57  ;;  %v3182_v12 = vsel %vm215_vm1, %v3125_v50, 0.0 }
 0x214   : > { %v2573_v1 = vadd.f32 %v2532_v54, %v5262_v15  ;;  %v3082_v35 = vadd.f32 %v3081_v11, %v3080_v10  ;;  %v3181_v22 = vadd.f32 %v3180_v45, %v3179_v26  ;;  %v3083_v40 = vsel %vm215_vm1, %v2864_v53, 0.0 }
 0x215   : > { %v3528_v62 = vpack.c.bf16 %v2865_v7, %v2865_v7  ;;  %v3127_v61 = vmul.f32 %v2865_v7, %v2865_v7  ;;  %3028 = vst.msk [vmem:[%s5143_s5 + $0x78] sm:$0xf] %vm2997_vm4, %v3530_v32  ;;  %v2868_v21 = vadd.f32 %v3990_v46, %v2575_v28  ;;  %v3184_v4 = vsel %vm215_vm1, %v3126_v14, 0.0 }
 0x216   : > { %v3183_v55 = vadd.f32 %v3182_v12, %v3181_v22  ;;  %v3084_v38 = vadd.f32 %v3083_v40, %v3082_v35  ;;  %v2866_v34 = vadd.f32 %v2825_v8, %v2573_v1  ;;  %v3085_v15 = vsel %vm215_vm1, %v2865_v7, 0.0 }
 0x217   : > { %3026 = vst.msk [vmem:[%s5143_s5 + $0x70] sm:$0xf] %vm2997_vm4, %v3528_v62  ;;  %v3129_v17 = vmul.f32 %v2867_v57, %v2867_v57  ;;  %v3531_v5 = vpack.c.bf16 %v2868_v21, %v2868_v21  ;;  %v3186_v47 = vsel %vm215_vm1, %v3127_v61, 0.0  ;;  %v3089_v60 = vsel %vm215_vm1, %v2867_v57, 0.0 }
 0x218   : > { %v3086_v42 = vadd.f32 %v3085_v15, %v3084_v38  ;;  %v3185_v30 = vadd.f32 %v3184_v4, %v3183_v55  ;;  %v3529_v29 = vpack.c.bf16 %v2866_v34, %v2866_v34  ;;  %v3087_v31 = vsel %vm215_vm1, %v2866_v34, 0.0 }
 0x219   : > { %v3128_v58 = vmul.f32 %v2866_v34, %v2866_v34  ;;  %3029 = vst.msk [vmem:[%s5143_s5 + $0x7c] sm:$0xf] %vm2997_vm4, %v3531_v5  ;;  %v3130_v51 = vmul.f32 %v2868_v21, %v2868_v21  ;;  %v3190_v39 = vsel %vm215_vm1, %v3129_v17, 0.0  ;;  %v3091_v36 = vsel %vm215_vm1, %v2868_v21, 0.0 }
 0x21a   : > { %v3187_v0 = vadd.f32 %v3186_v47, %v3185_v30  ;;  %v3088_v24 = vadd.f32 %v3087_v31, %v3086_v42  ;;  %3027 = vst.msk [vmem:[%s5143_s5 + $0x74] sm:$0xf] %vm2997_vm4, %v3529_v29 }
 0x21b   : > { %v3188_v44 = vsel %vm215_vm1, %v3128_v58, 0.0  ;;  %v3192_v20 = vsel %vm215_vm1, %v3130_v51, 0.0 }
 0x21c   : > { %v3090_v6 = vadd.f32 %v3089_v60, %v3088_v24  ;;  %v3189_v37 = vadd.f32 %v3188_v44, %v3187_v0 }
 0x21e   : > { %v3092_v56 = vadd.f32 %v3091_v36, %v3090_v6  ;;  %v3191_v9 = vadd.f32 %v3190_v39, %v3189_v37 }
 0x220   : > { %v3093_v33 = vrot.slane %v3092_v56, 4  ;;  %v3193_v59 = vadd.f32 %v3192_v20, %v3191_v9 }
 0x222   : > { %v3094_v25 = vadd.f32 %v3093_v33, %v3092_v56  ;;  %v3194_v3 = vrot.slane %v3193_v59, 4 }
 0x224   : > { %v3095_v53 = vrot.slane %v3094_v25, 2  ;;  %v3195_v52 = vadd.f32 %v3194_v3, %v3193_v59 }
 0x226   : > { %v3096_v27 = vadd.f32 %v3095_v53, %v3094_v25  ;;  %v3196_v11 = vrot.slane %v3195_v52, 2 }
 0x228   : > { %v3097_v41 = vrot.slane %v3096_v27, 1  ;;  %v3197_v43 = vadd.f32 %v3196_v11, %v3195_v52 }
 0x22a   : > { %v3198_v13 = vrot.slane %v3197_v43, 1  ;;  %v3098_v50 = vadd.f32 %v3097_v41, %v3096_v27 }
 0x22c   : > { %v3199_v48 = vadd.f32 %v3198_v13, %v3197_v43 }
 0x22e   : > { %v3201_v19 = vsel %vm3200_vm5, %v3098_v50, %v3199_v48 }
 0x22f   : > { %3202 = vst.msk [vmem:[%s171_s9] sm:$0x3] %vm218_vm2, %v3201_v19 }
 0x230   : > { %4056 = shalt.err (!%p4053_p3)
}
 0x231   : > { %s4057_s27 = scalar_lea.hbm %s5368_s19, 32  ;;  %s4061_s30 = scalar_lea.hbm %s5407_s3, 64 }
 0x232   : > { %p4058_p4 = scmp.ne.s32.totalorder %s5368_s19, %s4057_s27  ;;  %p4062_p9 = scmp.lt.s32.totalorder %s5368_s19, %s5407_s3 }
 0x233   : > { %p4063_p10 = scmp.lt.s32.totalorder %s4061_s30, %s4057_s27 }
 0x234   : > { %p4059_p7 = pnand %p4058_p4, %p4165_p5 }
 0x235   : > { %p4064_p11 = por %p4063_p10, %p4062_p9 }
 0x236   : > { %p4060_p8 = pneg %p4059_p7 }
 0x238   : > { %p4065_p12 = pnand %p4064_p11, %p4060_p8 }
 0x23a   : > { %4068 = shalt.err (!%p4065_p12)
}
 0x23b   : > { %4003 = dma.vmem_to_hbm [thread:$0]  (%p4165_p5), %s3226_s10, 32, %s5368_s19, %s3209_s20  }
 0x23c PF: > { %p4009_p13 = scmp.ge.s32.totalorder %s4103_s15, 2  ;;  %s3245_s6 = sand.u32 1, %s4091_s12  }
 0x23d   : > { %s3246_s7 = scalar_lea.sflag [#allocation4], %s3245_s6 }
 0x23e   : > { %p4006_p0 = pnand %p4009_p13, %p4169_p6 }
 0x240   : > { %p4007_p1 = pneg %p4006_p0 }
 0x242   : > { %4086 = dma.done.wait (%p4007_p1), %s3246_s7, 32  }
 0x243   : > { %4088 = vsyncadd (%p4007_p1), %s3246_s7, 4294967264  ;;  %p14_p2 = scmp.ge.s32.totalorder %s4152_s18, 4   ;;  %s5478_s12 = smov %s4095_s13 }
 0x244   : > { %s5479_s13 = smov %s4099_s14  ;;  %s5480_s14 = smov %s4163_s21 }
 0x245   : > { %s5481_s15 = smov %s4152_s18  ;;  %16 = sbr.rel (!%p14_p2) target bundleno = 3 (0x3), region = 78 }
 0x24a   :  { %3251 = vsyncpa [#allocation4], 1 }
 0x24b   :  { %3253 = vsyncpa [#allocation4 + $0x1], 1 }

</bundles_post_ra>
